<compile_context>
chip_gen: v5e
topology: v5e:2x2
jax: 0.10.0
libtpu: 0.0.40
codegen_flags: <defaults>
</compile_context>

<pallas_src>
import functools
import math

import jax
import jax.numpy as jnp
from jax import lax
from jax.experimental import pallas as pl
from jax.experimental.pallas import tpu as pltpu

LANE = 128   # lane quantum (last dim)
SUB = 8      # sublane quantum (second-to-last dim)
_INV_SQRT2 = 1.0 / math.sqrt(2.0)


def _gelu_exact(x):
    # PyTorch nn.GELU() default: 0.5 * x * (1 + erf(x / sqrt(2)))
    return 0.5 * x * (1.0 + lax.erf(x * _INV_SQRT2))


def _round_up(n, m):
    return (n + m - 1) // m * m


# --------------------------------------------------------------------------
# Kernel
# --------------------------------------------------------------------------
def joint_policy_pis_kernel(s_ref, t_ref, w1_ref, b1_ref, w2_ref, b2_ref,
                            wo_ref, bo_ref, o_ref, *, n_split):
    # s_ref, t_ref : (TB, H)  f32   -- unpadded feature axis (H == hidden_dim)
    # w1_ref       : (H, Hp)  bf16  -- first-layer weight, [in, out] layout
    # w2_ref       : (Hp, Hp) bf16
    # wo_ref       : (Hp, Op) bf16
    # b1/b2_ref    : (1, Hp)  f32
    # bo_ref       : (1, Op)  f32
    # o_ref        : (TB, Op) f32   -- lane-dense output tile
    tb = s_ref.shape[0]
    rows = tb // n_split
    mxu = w1_ref.dtype

    # n_split independent chains: the scheduler overlaps one half's erf (EUP)
    # with the other half's matmul (MXU).
    for p in range(n_split):
        r = pl.ds(p * rows, rows)
        x = _gelu_exact(s_ref[r, :] + t_ref[r, :])                     # f32 VPU+EUP
        h = jnp.dot(x.astype(mxu), w1_ref[...],
                    preferred_element_type=jnp.float32) + b1_ref[...]  # K=H (32)
        h = _gelu_exact(h)
        h = jnp.dot(h.astype(mxu), w2_ref[...],
                    preferred_element_type=jnp.float32) + b2_ref[...]
        h = _gelu_exact(h)
        y = jnp.dot(h.astype(mxu), wo_ref[...],
                    preferred_element_type=jnp.float32) + bo_ref[...]
        o_ref[r, :] = y.astype(o_ref.dtype)


# --------------------------------------------------------------------------
# Parameter packing.
# Only the *output* feature axes are zero-padded to lane-dense multiples of
# 128; the first-layer input axis stays at the logical hidden_dim so the
# kernel consumes s/t unpadded.  Padded rows/cols are zero, so the logical
# [:, :out_dim] slice of the result is unchanged (GELU(0) = 0).
# --------------------------------------------------------------------------
def pack_params(params, mxu_dtype=jnp.bfloat16):
    # Set mxu_dtype=jnp.float32 for bit-closer parity with the f32 PyTorch
    # module (slower multi-pass MXU, 2x weight bytes).
    H_in, H = params["w1"].shape
    O = params["wo"].shape[1]
    Hp = _round_up(max(H, LANE), LANE)
    Op = _round_up(max(O, LANE), LANE)

    def pad2(w, r, c):
        return jnp.zeros((r, c), w.dtype).at[:w.shape[0], :w.shape[1]].set(w)

    return {
        "w1": pad2(params["w1"], H_in, Hp).astype(mxu_dtype),   # (H, Hp)
        "b1": pad2(params["b1"], 1, Hp),                        # f32
        "w2": pad2(params["w2"], Hp, Hp).astype(mxu_dtype),
        "b2": pad2(params["b2"], 1, Hp),
        "wo": pad2(params["wo"], Hp, Op).astype(mxu_dtype),
        "bo": pad2(params["bo"], 1, Op),
    }


# --------------------------------------------------------------------------
# Wrapper
# --------------------------------------------------------------------------
@functools.partial(jax.jit, static_argnames=("out_dim", "batch_tile"))
def joint_policy_pis_forward(s, t, packed, out_dim, *, batch_tile=None):
    """s, t: [B, hidden_dim] float32. packed: output of pack_params."""
    B, H = s.shape
    Hp = packed["w2"].shape[0]
    Op = packed["wo"].shape[1]

    # ---- grid / tile sizing: one fat step for small batches ----------------
    if batch_tile is None:
        batch_tile = 512
    if B <= batch_tile:
        TB, Bp = B, B                      # grid = (1,), no batch padding at all
    else:
        TB = _round_up(batch_tile, 2 * SUB)
        Bp = _round_up(B, TB)
    n_steps = Bp // TB
    # split a step into 2 half-tiles (MXU/EUP overlap) when halves stay
    # sublane-aligned (multiple of 8 rows).
    n_split = 2 if (TB >= 32 and TB % (2 * SUB) == 0) else 1

    if Bp != B:
        # padded rows compute GELU(bias)-derived junk; discarded by final slice
        s = jnp.zeros((Bp, H), s.dtype).at[:B].set(s)
        t = jnp.zeros((Bp, H), t.dtype).at[:B].set(t)

    # ---- VMEM budget check (resident weights + pipelined tiles) ------------
    weight_bytes = sum(int(v.size) * v.dtype.itemsize for v in packed.values())
    act_bytes = (2 * 2 * TB * H * s.dtype.itemsize   # double-buffered s,t tiles
                 + 2 * TB * Op * 4                   # double-buffered out tile
                 + 2 * TB * Hp * 4)                  # live activation headroom
    est = weight_bytes + act_bytes
    try:
        vmem_cap = int(pltpu.get_tpu_info().vmem_capacity_bytes)
    except Exception:
        vmem_cap = 64 << 20                          # v7x per-TC VMEM (worst case)
    if est > vmem_cap - (8 << 20):
        # TODO(synk): add a K/N-tiled weight-streaming fallback for hidden_dim
        # large enough that resident weights exceed VMEM (first hit on v7x 64MiB).
        raise NotImplementedError(
            "hidden/out dims too large for the resident-weight kernel")
    vmem_limit = None
    if est > (24 << 20):
        vmem_limit = int(min(est * 3 // 2, vmem_cap - (4 << 20)))

    # ---- cost estimate on the compute actually performed -------------------
    flops = 2 * Bp * (H * Hp + Hp * Hp + Hp * Op)
    transcendentals = Bp * (H + 2 * Hp)
    bytes_accessed = (2 * Bp * H * s.dtype.itemsize + weight_bytes + Bp * Op * 4)

    # ---- BlockSpecs ---------------------------------------------------------
    def const_spec(shape):
        nd = len(shape)
        if n_steps > 1:
            # constant index_map -> single-buffer the resident operand
            return pl.BlockSpec(shape, lambda *_: (0,) * nd,
                                pipeline_mode=pl.Buffered(1))
        return pl.BlockSpec(shape, lambda *_: (0,) * nd)

    in_specs = [
        pl.BlockSpec((TB, H), lambda i: (i, 0)),     # s batch tile (unpadded H)
        pl.BlockSpec((TB, H), lambda i: (i, 0)),     # t batch tile
        const_spec((H, Hp)),                         # W1 (resident)
        const_spec((1, Hp)),                         # b1
        const_spec((Hp, Hp)),                        # W2
        const_spec((1, Hp)),                         # b2
        const_spec((Hp, Op)),                        # Wout
        const_spec((1, Op)),                         # bout
    ]

    out = pl.pallas_call(
        functools.partial(joint_policy_pis_kernel, n_split=n_split),
        out_shape=jax.ShapeDtypeStruct((Bp, Op), s.dtype),
        grid=(n_steps,),
        in_specs=in_specs,
        out_specs=pl.BlockSpec((TB, Op), lambda i: (i, 0)),
        compiler_params=pltpu.CompilerParams(
            # only megacore-split when each core gets >=256 rows of real work
            dimension_semantics=(("parallel",)
                                 if (n_steps > 1 and TB >= 256)
                                 else ("arbitrary",)),
            vmem_limit_bytes=vmem_limit),
        cost_estimate=pl.CostEstimate(
            flops=flops,
            transcendentals=transcendentals,
            bytes_accessed=bytes_accessed),
    )(s, t, packed["w1"], packed["b1"], packed["w2"], packed["b2"],
      packed["wo"], packed["bo"])

    # Strip batch/lane padding back to the module's logical output shape.
    return out[:B, :out_dim]


# --------------------------------------------------------------------------
# Synthetic init (mimics nn.Linear uniform(-1/sqrt(in), 1/sqrt(in)));
# weights stored as [in_features, out_features] (transposed vs. PyTorch).
# --------------------------------------------------------------------------
def init_params(key, hidden_dim, out_dim):
    ks = jax.random.split(key, 6)

    def lin(kw, kb, n_in, n_out):
        b = 1.0 / math.sqrt(n_in)
        w = jax.random.uniform(kw, (n_in, n_out), jnp.float32, -b, b)
        bias = jax.random.uniform(kb, (1, n_out), jnp.float32, -b, b)
        return w, bias

    w1, b1 = lin(ks[0], ks[1], hidden_dim, hidden_dim)
    w2, b2 = lin(ks[2], ks[3], hidden_dim, hidden_dim)
    wo, bo = lin(ks[4], ks[5], hidden_dim, out_dim)
    return {"w1": w1, "b1": b1, "w2": w2, "b2": b2, "wo": wo, "bo": bo}


def reference_forward(s, t, params):
    # Pure-JAX f32 reference of the same math.
    x = _gelu_exact(s + t)
    x = _gelu_exact(x @ params["w1"] + params["b1"])
    x = _gelu_exact(x @ params["w2"] + params["b2"])
    return x @ params["wo"] + params["bo"]


if __name__ == "__main__":
    # Small shapes consistent with the module:
    #   s_dim = 4 -> out_dim = 2*s_dim = 8
    #   s_emb_dim = t_dim = hidden_dim = 32, num_layers = 2, batch = 64
    s_dim = 4
    hidden_dim = 32
    out_dim = 2 * s_dim
    batch = 64

    key = jax.random.PRNGKey(0)
    k_s, k_t, k_p = jax.random.split(key, 3)

    s = jax.random.normal(k_s, (batch, hidden_dim), jnp.float32)
    t = jax.random.normal(k_t, (batch, hidden_dim), jnp.float32)
    params = init_params(k_p, hidden_dim, out_dim)
    packed = pack_params(params)

    # default sizing -> single grid step (latency-bound regime), 2-way
    # half-tile split inside the kernel for MXU/EUP overlap.
    out = joint_policy_pis_forward(s, t, packed, out_dim)
    out = jax.block_until_ready(out)

    ref = reference_forward(s, t, params)
    assert out.shape == (batch, out_dim)
    # bf16 MXU inputs with f32 accumulation -> loosen tolerance vs f32 reference.
    err = float(jnp.max(jnp.abs(out - ref)))
    assert jnp.allclose(out, ref, atol=5e-2, rtol=5e-2), err

    print("KERNEL_OK")
</pallas_src>

<mosaic_0001>
module attributes {stable_mosaic.version = 11 : i64} {
  func.func @joint_policy_pis_kernel(%arg0: i32, %arg1: memref<64x32xf32, #tpu.memory_space<vmem>>, %arg2: memref<64x32xf32, #tpu.memory_space<vmem>>, %arg3: memref<32x128xbf16, #tpu.memory_space<vmem>>, %arg4: memref<1x128xf32, #tpu.memory_space<vmem>>, %arg5: memref<128x128xbf16, #tpu.memory_space<vmem>>, %arg6: memref<1x128xf32, #tpu.memory_space<vmem>>, %arg7: memref<128x128xbf16, #tpu.memory_space<vmem>>, %arg8: memref<1x128xf32, #tpu.memory_space<vmem>>, %arg9: memref<64x128xf32, #tpu.memory_space<vmem>>) attributes {dimension_semantics = [#tpu.dimension_semantics<arbitrary>], iteration_bounds = array<i64: 1>, scalar_prefetch = 0 : i64, scratch_operands = 0 : i64, tpu.core_type = #tpu.core_type<tc>, window_params = [{transform_indices = @transform_0, window_bounds = array<i64: 64, 32>}, {transform_indices = @transform_1, window_bounds = array<i64: 64, 32>}, {pipeline_mode = #tpu.pipeline_mode<synchronous>, transform_indices = @transform_2, window_bounds = array<i64: 32, 128>}, {pipeline_mode = #tpu.pipeline_mode<synchronous>, transform_indices = @transform_3, window_bounds = array<i64: 1, 128>}, {pipeline_mode = #tpu.pipeline_mode<synchronous>, transform_indices = @transform_4, window_bounds = array<i64: 128, 128>}, {pipeline_mode = #tpu.pipeline_mode<synchronous>, transform_indices = @transform_5, window_bounds = array<i64: 1, 128>}, {pipeline_mode = #tpu.pipeline_mode<synchronous>, transform_indices = @transform_6, window_bounds = array<i64: 128, 128>}, {pipeline_mode = #tpu.pipeline_mode<synchronous>, transform_indices = @transform_7, window_bounds = array<i64: 1, 128>}, {transform_indices = @transform_8, window_bounds = array<i64: 64, 128>}]} {
    %c0 = arith.constant 0 : index
    %c0_0 = arith.constant 0 : index
    %0 = vector.load %arg1[%c0, %c0_0] : memref<64x32xf32, #tpu.memory_space<vmem>>, vector<32x32xf32>
    %c0_1 = arith.constant 0 : index
    %c0_2 = arith.constant 0 : index
    %1 = vector.load %arg2[%c0_1, %c0_2] : memref<64x32xf32, #tpu.memory_space<vmem>>, vector<32x32xf32>
    %2 = arith.addf %0, %1 : vector<32x32xf32>
    %cst = arith.constant 5.000000e-01 : f32
    %3 = vector.broadcast %cst : f32 to vector<32x32xf32>
    %4 = arith.mulf %3, %2 : vector<32x32xf32>
    %cst_3 = arith.constant 0.707106769 : f32
    %5 = vector.broadcast %cst_3 : f32 to vector<32x32xf32>
    %6 = arith.mulf %2, %5 : vector<32x32xf32>
    %7 = math.erf %6 : vector<32x32xf32>
    %cst_4 = arith.constant 1.000000e+00 : f32
    %8 = vector.broadcast %cst_4 : f32 to vector<32x32xf32>
    %9 = arith.addf %8, %7 : vector<32x32xf32>
    %10 = arith.mulf %4, %9 : vector<32x32xf32>
    %11 = arith.truncf %10 : vector<32x32xf32> to vector<32x32xbf16>
    %c0_5 = arith.constant 0 : index
    %c0_6 = arith.constant 0 : index
    %12 = vector.load %arg3[%c0_5, %c0_6] : memref<32x128xbf16, #tpu.memory_space<vmem>>, vector<32x128xbf16>
    %cst_7 = arith.constant dense<0.000000e+00> : vector<32x128xf32>
    %13 = tpu.matmul %11, %12, %cst_7 {dimension_numbers = #tpu.dot_dimension_numbers<[1], [0], [0], [1], [0, 0, 1, 1], [], []>} : vector<32x32xbf16>, vector<32x128xbf16>, vector<32x128xf32> -> vector<32x128xf32>
    %c0_8 = arith.constant 0 : index
    %c0_9 = arith.constant 0 : index
    %14 = vector.load %arg4[%c0_8, %c0_9] : memref<1x128xf32, #tpu.memory_space<vmem>>, vector<1x128xf32>
    %15 = vector.broadcast %14 : vector<1x128xf32> to vector<32x128xf32>
    %16 = arith.addf %13, %15 : vector<32x128xf32>
    %cst_10 = arith.constant 5.000000e-01 : f32
    %17 = vector.broadcast %cst_10 : f32 to vector<32x128xf32>
    %18 = arith.mulf %17, %16 : vector<32x128xf32>
    %cst_11 = arith.constant 0.707106769 : f32
    %19 = vector.broadcast %cst_11 : f32 to vector<32x128xf32>
    %20 = arith.mulf %16, %19 : vector<32x128xf32>
    %21 = math.erf %20 : vector<32x128xf32>
    %cst_12 = arith.constant 1.000000e+00 : f32
    %22 = vector.broadcast %cst_12 : f32 to vector<32x128xf32>
    %23 = arith.addf %22, %21 : vector<32x128xf32>
    %24 = arith.mulf %18, %23 : vector<32x128xf32>
    %25 = arith.truncf %24 : vector<32x128xf32> to vector<32x128xbf16>
    %c0_13 = arith.constant 0 : index
    %c0_14 = arith.constant 0 : index
    %26 = vector.load %arg5[%c0_13, %c0_14] : memref<128x128xbf16, #tpu.memory_space<vmem>>, vector<128x128xbf16>
    %cst_15 = arith.constant dense<0.000000e+00> : vector<32x128xf32>
    %27 = tpu.matmul %25, %26, %cst_15 {dimension_numbers = #tpu.dot_dimension_numbers<[1], [0], [0], [1], [0, 0, 1, 1], [], []>} : vector<32x128xbf16>, vector<128x128xbf16>, vector<32x128xf32> -> vector<32x128xf32>
    %c0_16 = arith.constant 0 : index
    %c0_17 = arith.constant 0 : index
    %28 = vector.load %arg6[%c0_16, %c0_17] : memref<1x128xf32, #tpu.memory_space<vmem>>, vector<1x128xf32>
    %29 = vector.broadcast %28 : vector<1x128xf32> to vector<32x128xf32>
    %30 = arith.addf %27, %29 : vector<32x128xf32>
    %cst_18 = arith.constant 5.000000e-01 : f32
    %31 = vector.broadcast %cst_18 : f32 to vector<32x128xf32>
    %32 = arith.mulf %31, %30 : vector<32x128xf32>
    %cst_19 = arith.constant 0.707106769 : f32
    %33 = vector.broadcast %cst_19 : f32 to vector<32x128xf32>
    %34 = arith.mulf %30, %33 : vector<32x128xf32>
    %35 = math.erf %34 : vector<32x128xf32>
    %cst_20 = arith.constant 1.000000e+00 : f32
    %36 = vector.broadcast %cst_20 : f32 to vector<32x128xf32>
    %37 = arith.addf %36, %35 : vector<32x128xf32>
    %38 = arith.mulf %32, %37 : vector<32x128xf32>
    %39 = arith.truncf %38 : vector<32x128xf32> to vector<32x128xbf16>
    %c0_21 = arith.constant 0 : index
    %c0_22 = arith.constant 0 : index
    %40 = vector.load %arg7[%c0_21, %c0_22] : memref<128x128xbf16, #tpu.memory_space<vmem>>, vector<128x128xbf16>
    %cst_23 = arith.constant dense<0.000000e+00> : vector<32x128xf32>
    %41 = tpu.matmul %39, %40, %cst_23 {dimension_numbers = #tpu.dot_dimension_numbers<[1], [0], [0], [1], [0, 0, 1, 1], [], []>} : vector<32x128xbf16>, vector<128x128xbf16>, vector<32x128xf32> -> vector<32x128xf32>
    %c0_24 = arith.constant 0 : index
    %c0_25 = arith.constant 0 : index
    %42 = vector.load %arg8[%c0_24, %c0_25] : memref<1x128xf32, #tpu.memory_space<vmem>>, vector<1x128xf32>
    %43 = vector.broadcast %42 : vector<1x128xf32> to vector<32x128xf32>
    %44 = arith.addf %41, %43 : vector<32x128xf32>
    %c0_26 = arith.constant 0 : index
    %c0_27 = arith.constant 0 : index
    %45 = vector.load %arg9[%c0_26, %c0_27] : memref<64x128xf32, #tpu.memory_space<vmem>>, vector<32x128xf32>
    tpu.vector_store %arg9[%c0_26, %c0_27], %44 {strides = array<i32>} : memref<64x128xf32, #tpu.memory_space<vmem>>, vector<32x128xf32>,
    %c32 = arith.constant 32 : index
    %c0_28 = arith.constant 0 : index
    %46 = vector.load %arg1[%c32, %c0_28] : memref<64x32xf32, #tpu.memory_space<vmem>>, vector<32x32xf32>
    %c32_29 = arith.constant 32 : index
    %c0_30 = arith.constant 0 : index
    %47 = vector.load %arg2[%c32_29, %c0_30] : memref<64x32xf32, #tpu.memory_space<vmem>>, vector<32x32xf32>
    %48 = arith.addf %46, %47 : vector<32x32xf32>
    %cst_31 = arith.constant 5.000000e-01 : f32
    %49 = vector.broadcast %cst_31 : f32 to vector<32x32xf32>
    %50 = arith.mulf %49, %48 : vector<32x32xf32>
    %cst_32 = arith.constant 0.707106769 : f32
    %51 = vector.broadcast %cst_32 : f32 to vector<32x32xf32>
    %52 = arith.mulf %48, %51 : vector<32x32xf32>
    %53 = math.erf %52 : vector<32x32xf32>
    %cst_33 = arith.constant 1.000000e+00 : f32
    %54 = vector.broadcast %cst_33 : f32 to vector<32x32xf32>
    %55 = arith.addf %54, %53 : vector<32x32xf32>
    %56 = arith.mulf %50, %55 : vector<32x32xf32>
    %57 = arith.truncf %56 : vector<32x32xf32> to vector<32x32xbf16>
    %c0_34 = arith.constant 0 : index
    %c0_35 = arith.constant 0 : index
    %58 = vector.load %arg3[%c0_34, %c0_35] : memref<32x128xbf16, #tpu.memory_space<vmem>>, vector<32x128xbf16>
    %cst_36 = arith.constant dense<0.000000e+00> : vector<32x128xf32>
    %59 = tpu.matmul %57, %58, %cst_36 {dimension_numbers = #tpu.dot_dimension_numbers<[1], [0], [0], [1], [0, 0, 1, 1], [], []>} : vector<32x32xbf16>, vector<32x128xbf16>, vector<32x128xf32> -> vector<32x128xf32>
    %c0_37 = arith.constant 0 : index
    %c0_38 = arith.constant 0 : index
    %60 = vector.load %arg4[%c0_37, %c0_38] : memref<1x128xf32, #tpu.memory_space<vmem>>, vector<1x128xf32>
    %61 = vector.broadcast %60 : vector<1x128xf32> to vector<32x128xf32>
    %62 = arith.addf %59, %61 : vector<32x128xf32>
    %cst_39 = arith.constant 5.000000e-01 : f32
    %63 = vector.broadcast %cst_39 : f32 to vector<32x128xf32>
    %64 = arith.mulf %63, %62 : vector<32x128xf32>
    %cst_40 = arith.constant 0.707106769 : f32
    %65 = vector.broadcast %cst_40 : f32 to vector<32x128xf32>
    %66 = arith.mulf %62, %65 : vector<32x128xf32>
    %67 = math.erf %66 : vector<32x128xf32>
    %cst_41 = arith.constant 1.000000e+00 : f32
    %68 = vector.broadcast %cst_41 : f32 to vector<32x128xf32>
    %69 = arith.addf %68, %67 : vector<32x128xf32>
    %70 = arith.mulf %64, %69 : vector<32x128xf32>
    %71 = arith.truncf %70 : vector<32x128xf32> to vector<32x128xbf16>
    %c0_42 = arith.constant 0 : index
    %c0_43 = arith.constant 0 : index
    %72 = vector.load %arg5[%c0_42, %c0_43] : memref<128x128xbf16, #tpu.memory_space<vmem>>, vector<128x128xbf16>
    %cst_44 = arith.constant dense<0.000000e+00> : vector<32x128xf32>
    %73 = tpu.matmul %71, %72, %cst_44 {dimension_numbers = #tpu.dot_dimension_numbers<[1], [0], [0], [1], [0, 0, 1, 1], [], []>} : vector<32x128xbf16>, vector<128x128xbf16>, vector<32x128xf32> -> vector<32x128xf32>
    %c0_45 = arith.constant 0 : index
    %c0_46 = arith.constant 0 : index
    %74 = vector.load %arg6[%c0_45, %c0_46] : memref<1x128xf32, #tpu.memory_space<vmem>>, vector<1x128xf32>
    %75 = vector.broadcast %74 : vector<1x128xf32> to vector<32x128xf32>
    %76 = arith.addf %73, %75 : vector<32x128xf32>
    %cst_47 = arith.constant 5.000000e-01 : f32
    %77 = vector.broadcast %cst_47 : f32 to vector<32x128xf32>
    %78 = arith.mulf %77, %76 : vector<32x128xf32>
    %cst_48 = arith.constant 0.707106769 : f32
    %79 = vector.broadcast %cst_48 : f32 to vector<32x128xf32>
    %80 = arith.mulf %76, %79 : vector<32x128xf32>
    %81 = math.erf %80 : vector<32x128xf32>
    %cst_49 = arith.constant 1.000000e+00 : f32
    %82 = vector.broadcast %cst_49 : f32 to vector<32x128xf32>
    %83 = arith.addf %82, %81 : vector<32x128xf32>
    %84 = arith.mulf %78, %83 : vector<32x128xf32>
    %85 = arith.truncf %84 : vector<32x128xf32> to vector<32x128xbf16>
    %c0_50 = arith.constant 0 : index
    %c0_51 = arith.constant 0 : index
    %86 = vector.load %arg7[%c0_50, %c0_51] : memref<128x128xbf16, #tpu.memory_space<vmem>>, vector<128x128xbf16>
    %cst_52 = arith.constant dense<0.000000e+00> : vector<32x128xf32>
    %87 = tpu.matmul %85, %86, %cst_52 {dimension_numbers = #tpu.dot_dimension_numbers<[1], [0], [0], [1], [0, 0, 1, 1], [], []>} : vector<32x128xbf16>, vector<128x128xbf16>, vector<32x128xf32> -> vector<32x128xf32>
    %c0_53 = arith.constant 0 : index
    %c0_54 = arith.constant 0 : index
    %88 = vector.load %arg8[%c0_53, %c0_54] : memref<1x128xf32, #tpu.memory_space<vmem>>, vector<1x128xf32>
    %89 = vector.broadcast %88 : vector<1x128xf32> to vector<32x128xf32>
    %90 = arith.addf %87, %89 : vector<32x128xf32>
    %c32_55 = arith.constant 32 : index
    %c0_56 = arith.constant 0 : index
    %91 = vector.load %arg9[%c32_55, %c0_56] : memref<64x128xf32, #tpu.memory_space<vmem>>, vector<32x128xf32>
    tpu.vector_store %arg9[%c32_55, %c0_56], %90 {strides = array<i32>} : memref<64x128xf32, #tpu.memory_space<vmem>>, vector<32x128xf32>,
    return
  }
  func.func @transform_0(%arg0: i32) -> (i32, i32) {
    %c0_i32 = arith.constant 0 : i32
    %c0_i32_0 = arith.constant 0 : i32
    return %arg0, %c0_i32 : i32, i32
  }
  func.func @transform_1(%arg0: i32) -> (i32, i32) {
    %c0_i32 = arith.constant 0 : i32
    %c0_i32_0 = arith.constant 0 : i32
    return %arg0, %c0_i32 : i32, i32
  }
  func.func @transform_2(%arg0: i32) -> (i32, i32) {
    %c0_i32 = arith.constant 0 : i32
    %c0_i32_0 = arith.constant 0 : i32
    %c0_i32_1 = arith.constant 0 : i32
    return %c0_i32, %c0_i32_0 : i32, i32
  }
  func.func @transform_3(%arg0: i32) -> (i32, i32) {
    %c0_i32 = arith.constant 0 : i32
    %c0_i32_0 = arith.constant 0 : i32
    %c0_i32_1 = arith.constant 0 : i32
    return %c0_i32, %c0_i32_0 : i32, i32
  }
  func.func @transform_4(%arg0: i32) -> (i32, i32) {
    %c0_i32 = arith.constant 0 : i32
    %c0_i32_0 = arith.constant 0 : i32
    %c0_i32_1 = arith.constant 0 : i32
    return %c0_i32, %c0_i32_0 : i32, i32
  }
  func.func @transform_5(%arg0: i32) -> (i32, i32) {
    %c0_i32 = arith.constant 0 : i32
    %c0_i32_0 = arith.constant 0 : i32
    %c0_i32_1 = arith.constant 0 : i32
    return %c0_i32, %c0_i32_0 : i32, i32
  }
  func.func @transform_6(%arg0: i32) -> (i32, i32) {
    %c0_i32 = arith.constant 0 : i32
    %c0_i32_0 = arith.constant 0 : i32
    %c0_i32_1 = arith.constant 0 : i32
    return %c0_i32, %c0_i32_0 : i32, i32
  }
  func.func @transform_7(%arg0: i32) -> (i32, i32) {
    %c0_i32 = arith.constant 0 : i32
    %c0_i32_0 = arith.constant 0 : i32
    %c0_i32_1 = arith.constant 0 : i32
    return %c0_i32, %c0_i32_0 : i32, i32
  }
  func.func @transform_8(%arg0: i32) -> (i32, i32) {
    %c0_i32 = arith.constant 0 : i32
    %c0_i32_0 = arith.constant 0 : i32
    return %arg0, %c0_i32 : i32, i32
  }
}

</mosaic_0001>

<bundles_post_ra>
// kernel: joint_policy_pis_forward.1
= control target key start
LH: loop header
LB: loop body
LE: loop exit
PB: predicated region body
PF: predicated region fallthrough
CT: control target
= control target key end

     0   :  { %vm240_vm11 = vcmask 261120   ;;  %s2844_s2 = inlined_call_operand.vmem [shape: bf16[32,128], index: 2, kind: input, shape index: {}]   ;;  %s2845_s0 = inlined_call_operand.vmem [shape: f32[64,32], index: 0, kind: input, shape index: {}]   ;;  %s2846_s1 = inlined_call_operand.vmem [shape: f32[64,32], index: 1, kind: input, shape index: {}]   ;;  %s2847_s3 = inlined_call_operand.vmem [shape: f32[1,128], index: 3, kind: input, shape index: {}]   ;;  %s2848_s5 = inlined_call_operand.vmem [shape: f32[1,128], index: 5, kind: input, shape index: {}]   ;;  %s2849_s4 = inlined_call_operand.vmem [shape: bf16[128,128], index: 4, kind: input, shape index: {}]   ;;  %s2850_s7 = inlined_call_operand.vmem [shape: f32[1,128], index: 7, kind: input, shape index: {}]   ;;  %s2851_s6 = inlined_call_operand.vmem [shape: bf16[128,128], index: 6, kind: input, shape index: {}]   ;;  %s2852_s8 = inlined_call_operand.vmem [shape: f32[64,128], index: 8, kind: output, shape index: {}]  }
   0x1   :  { %v1746_v0 = vld [vmem:[%s2844_s2 + $0x8] sm:$0xff]  ;;  %v1745_v2 = vld [vmem:[%s2844_s2] sm:$0xff]  ;;  %v32_v51 = vld [vmem:[%s2845_s0 + $0x10] sm:$0xff] }
   0x2   :  { %v1764_v1 = vld [vmem:[%s2844_s2 + $0x8] sm:$0xff]  ;;  %v1763_v3 = vld [vmem:[%s2844_s2] sm:$0xff]  ;;  %253 = vmatpush.bf16.msra.mxu0 %v1746_v0  ;;  %v33_v59 = vld [vmem:[%s2845_s0 + $0x18] sm:$0xff] }
   0x3   :  { %v30_v4 = vld [vmem:[%s2845_s0] sm:$0xff]  ;;  %v31_v5 = vld [vmem:[%s2845_s0 + $0x8] sm:$0xff]  ;;  %1022 = vmatpush.bf16.msra.mxu3 %v1764_v1  ;;  %v36_v60 = vld [vmem:[%s2846_s1 + $0x10] sm:$0xff] }
   0x4   :  { %v34_v6 = vld [vmem:[%s2846_s1] sm:$0xff]  ;;  %v35_v7 = vld [vmem:[%s2846_s1 + $0x8] sm:$0xff]  ;;  %v37_v61 = vld [vmem:[%s2846_s1 + $0x18] sm:$0xff] }
   0x5   :  { %v800_v8 = vld [vmem:[%s2845_s0 + $0x20] sm:$0xff]  ;;  %v1907_v9 = vadd.f32 %v34_v6, %v30_v4  ;;  %v1909_v10 = vadd.f32 %v35_v7, %v31_v5  ;;  %v801_v11 = vld [vmem:[%s2845_s0 + $0x28] sm:$0xff] }
   0x6   :  { %v804_v12 = vld [vmem:[%s2846_s1 + $0x20] sm:$0xff]  ;;  %v805_v13 = vld [vmem:[%s2846_s1 + $0x28] sm:$0xff]  ;;  %254 = vmatpush.bf16.msra.mxu0 %v1745_v2 }
   0x7   :  { %v1920_v14 = vadd.f32 %v804_v12, %v800_v8  ;;  %v1922_v15 = vadd.f32 %v805_v13, %v801_v11  ;;  %v1925_v16 = vmul.f32 0.70710677, %v1907_v9  ;;  %v1928_v17 = vmul.f32 0.70710677, %v1909_v10  ;;  %1023 = vmatpush.bf16.msra.mxu3 %v1763_v3 }
   0x8   :  { %v1985_v8 = vadd.f32 %v36_v60, %v32_v51  ;;  %v1987_v11 = vadd.f32 %v37_v61, %v33_v59 }
   0x9   :  { %v1931_v18 = vmul.f32 0.70710677, %v1920_v14  ;;  %v1934_v19 = vmul.f32 0.70710677, %v1922_v15  ;;  %v50_v20 = vmul.f32 %v1925_v16, %v1925_v16  ;;  %v90_v21 = vmul.f32 %v1928_v17, %v1928_v17 }
   0xb   :  { %v820_v22 = vmul.f32 %v1931_v18, %v1931_v18  ;;  %v860_v23 = vmul.f32 %v1934_v19, %v1934_v19  ;;  %v1944_v24 = vmin.f32 %v50_v20, 16.0  ;;  %v1946_v25 = vmin.f32 %v90_v21, 16.0 }
   0xd   :  { %v1948_v26 = vmin.f32 %v820_v22, 16.0  ;;  %v1950_v27 = vmin.f32 %v860_v23, 16.0  ;;  %v52_v28 = vmul.f32 2.1237322e-06, %v1944_v24  ;;  %v63_v29 = vmul.f32 3.8918573e-05, %v1944_v24 }
   0xe   :  { %v92_v30 = vmul.f32 2.1237322e-06, %v1946_v25  ;;  %v103_v31 = vmul.f32 3.8918573e-05, %v1946_v25 }
   0xf   :  { %v822_v32 = vmul.f32 2.1237322e-06, %v1948_v26  ;;  %v833_v33 = vmul.f32 3.8918573e-05, %v1948_v26  ;;  %v53_v34 = vadd.f32 0.00028619796, %v52_v28 }
  0x10   :  { %v64_v35 = vadd.f32 0.001143296, %v63_v29  ;;  %v93_v36 = vadd.f32 0.00028619796, %v92_v30  ;;  %v104_v37 = vadd.f32 0.001143296, %v103_v31 }
  0x11   :  { %v823_v38 = vadd.f32 0.00028619796, %v822_v32  ;;  %v834_v39 = vadd.f32 0.001143296, %v833_v33  ;;  %v54_v40 = vmul.f32 %v53_v34, %v1944_v24  ;;  %v862_v43 = vmul.f32 2.1237322e-06, %v1950_v27 }
  0x12   :  { %v65_v41 = vmul.f32 %v64_v35, %v1944_v24  ;;  %v94_v42 = vmul.f32 %v93_v36, %v1946_v25  ;;  %v105_v44 = vmul.f32 %v104_v37, %v1946_v25  ;;  %v873_v47 = vmul.f32 3.8918573e-05, %v1950_v27 }
  0x13   :  { %v824_v45 = vmul.f32 %v823_v38, %v1948_v26  ;;  %v835_v46 = vmul.f32 %v834_v39, %v1948_v26  ;;  %v55_v48 = vadd.f32 0.0036580483, %v54_v40  ;;  %v863_v58 = vadd.f32 0.00028619796, %v862_v43 }
  0x14   :  { %v66_v49 = vadd.f32 0.014752088, %v65_v41  ;;  %v95_v50 = vadd.f32 0.0036580483, %v94_v42  ;;  %v106_v52 = vadd.f32 0.014752088, %v105_v44 }
  0x15   :  { %v825_v53 = vadd.f32 0.0036580483, %v824_v45  ;;  %v836_v54 = vadd.f32 0.014752088, %v835_v46  ;;  %v56_v55 = vmul.f32 %v55_v48, %v1944_v24  ;;  %v874_v1 = vadd.f32 0.001143296, %v873_v47 }
  0x16   :  { %v67_v56 = vmul.f32 %v66_v49, %v1944_v24  ;;  %v96_v57 = vmul.f32 %v95_v50, %v1946_v25  ;;  %v107_v62 = vmul.f32 %v106_v52, %v1946_v25  ;;  %v864_v5 = vmul.f32 %v863_v58, %v1950_v27  ;;  %v806_v52 = vld [vmem:[%s2846_s1 + $0x30] sm:$0xff] }
  0x17   :  { %v826_v63 = vmul.f32 %v825_v53, %v1948_v26  ;;  %v837_v0 = vmul.f32 %v836_v54, %v1948_v26  ;;  %v57_v2 = vadd.f32 0.05243302, %v56_v55  ;;  %v875_v29 = vmul.f32 %v874_v1, %v1950_v27  ;;  %v807_v53 = vld [vmem:[%s2846_s1 + $0x38] sm:$0xff] }
  0x18   :  { %v68_v3 = vadd.f32 0.112945676, %v67_v56  ;;  %v97_v4 = vadd.f32 0.05243302, %v96_v57  ;;  %v108_v6 = vadd.f32 0.112945676, %v107_v62 }
  0x19   :  { %v827_v7 = vadd.f32 0.05243302, %v826_v63  ;;  %v58_v12 = vmul.f32 %v57_v2, %v1944_v24  ;;  %v838_v21 = vadd.f32 0.112945676, %v837_v0  ;;  %v865_v28 = vadd.f32 0.0036580483, %v864_v5 }
  0x1a   :  { %v69_v13 = vmul.f32 %v68_v3, %v1944_v24  ;;  %v98_v20 = vmul.f32 %v97_v4, %v1946_v25  ;;  %v109_v22 = vmul.f32 %v108_v6, %v1946_v25  ;;  %v1998_v37 = vmul.f32 0.70710677, %v1985_v8 }
  0x1b   :  { %v828_v23 = vmul.f32 %v827_v7, %v1948_v26  ;;  %v59_v30 = vadd.f32 0.18741608, %v58_v12  ;;  %v839_v33 = vmul.f32 %v838_v21, %v1948_v26  ;;  %v866_v36 = vmul.f32 %v865_v28, %v1950_v27 }
  0x1c   :  { %v70_v31 = vadd.f32 0.4994258, %v69_v13  ;;  %v99_v32 = vadd.f32 0.18741608, %v98_v20  ;;  %v110_v34 = vadd.f32 0.4994258, %v109_v22 }
  0x1d   :  { %v829_v35 = vadd.f32 0.18741608, %v828_v23  ;;  %v60_v38 = vmul.f32 %v59_v30, %v1944_v24  ;;  %v840_v41 = vadd.f32 0.4994258, %v839_v33  ;;  %v876_v44 = vadd.f32 0.014752088, %v875_v29 }
  0x1e   :  { %v71_v39 = vmul.f32 %v70_v31, %v1944_v24  ;;  %v100_v40 = vmul.f32 %v99_v32, %v1946_v25  ;;  %v111_v42 = vmul.f32 %v110_v34, %v1946_v25  ;;  %v2006_v45 = vmul.f32 0.70710677, %v1987_v11  ;;  %v802_v24 = vld [vmem:[%s2845_s0 + $0x30] sm:$0xff] }
  0x1f   :  { %v830_v43 = vmul.f32 %v829_v35, %v1948_v26  ;;  %v2009_v46 = vmul.f32 0.5, %v1907_v9  ;;  %v867_v48 = vadd.f32 0.05243302, %v866_v36  ;;  %v2015_v49 = vmul.f32 0.5, %v1909_v10  ;;  %v803_v9 = vld [vmem:[%s2845_s0 + $0x38] sm:$0xff] }
  0x20   :  { %v72_v47 = vadd.f32 1.0, %v71_v39  ;;  %v2017_v50 = vadd.f32 1.0, %v111_v42  ;;  %v841_v25 = vmul.f32 %v840_v41, %v1948_v26  ;;  %v877_v51 = vmul.f32 %v876_v44, %v1950_v27 }
  0x21   :  { %v61_v10 = vadd.f32 1.1283791, %v60_v38  ;;  %v101_v54 = vadd.f32 1.1283791, %v100_v40  ;;  %v130_v26 = vmul.f32 %v1998_v37, %v1998_v37  ;;  %v831_v56 = vadd.f32 1.1283791, %v830_v43 }
  0x22   :  { %1787 = vrcp.f32 %v72_v47  ;;  %v82_v55 = vand.u32 2147483647, %v72_v47  ;;  %v170_v57 = vmul.f32 %v2006_v45, %v2006_v45  ;;  %v84_v58 = vand.u32 2147483648, %v72_v47 }
  0x23   :  { %1789 = vrcp.f32 %v2017_v50  ;;  %v868_v59 = vmul.f32 %v867_v48, %v1950_v27  ;;  %v2036_v60 = vadd.f32 %v806_v52, %v802_v24  ;;  %v2038_v61 = vadd.f32 %v807_v53, %v803_v9 }
  0x24   :  { %v122_v62 = vand.u32 2147483647, %v2017_v50  ;;  %v124_v63 = vand.u32 2147483648, %v2017_v50  ;;  %v2042_v0 = vadd.f32 1.0, %v841_v25  ;;  %v878_v1 = vadd.f32 0.112945676, %v877_v51 }
  0x25   :  { %v62_v2 = vmul.f32 %v61_v10, %v1925_v16  ;;  %vm78_vm0 = vweird.f32 %v72_v47  ;;  %v102_v3 = vmul.f32 %v101_v54, %v1928_v17  ;;  %v2046_v4 = vmin.f32 %v130_v26, 16.0 }
  0x26   :  { %vm2048_vm1 = vcmp.eq.f32.partialorder %v82_v55, 8.507059e+37  ;;  %vm118_vm2 = vweird.f32 %v2017_v50  ;;  %v2054_v6 = vmul.f32 %v831_v56, %v1931_v18  ;;  %1791 = vrcp.f32 %v2042_v0 }
  0x27   :  { %v85_v12 = vor.u32 1.1754944e-38, %v84_v58  ;;  %v879_v16 = vmul.f32 %v878_v1, %v1950_v27  ;;  %v132_v13 = vmul.f32 2.1237322e-06, %v2046_v4  ;;  %v143_v17 = vmul.f32 3.8918573e-05, %v2046_v4 }
  0x28   :  { %v1788_v7 = vpop.eup %1787  ;;  %vm2060_vm3 = vcmp.eq.f32.partialorder %v122_v62, 8.507059e+37  ;;  %v125_v23 = vor.u32 1.1754944e-38, %v124_v63  ;;  %v869_v28 = vadd.f32 0.18741608, %v868_v59  ;;  %vm848_vm4 = vweird.f32 %v2042_v0 }
  0x29   :  { %v1790_v20 = vpop.eup %1789  ;;  %v74_v21 = vmul.f32 %v1788_v7, %v72_v47  ;;  %v880_v29 = vadd.f32 0.4994258, %v879_v16  ;;  %v2066_v30 = vmin.f32 %v170_v57, 16.0  ;;  %vm79_vm5 = vweird.f32 %v1788_v7 }
  0x2a   :  { %v114_v18 = vmul.f32 %v1790_v20, %v2017_v50  ;;  %v852_v32 = vand.u32 2147483647, %v2042_v0  ;;  %v133_v33 = vadd.f32 0.00028619796, %v132_v13  ;;  %vm119_vm6 = vweird.f32 %v1790_v20  ;;  %vm2074_vm7 = vmor %vm78_vm0, %vm79_vm5 }
  0x2b   :  { %v75_v31 = vsub.f32 1.0, %v74_v21  ;;  %v881_v35 = vmul.f32 %v880_v29, %v1950_v27  ;;  %v144_v36 = vadd.f32 0.001143296, %v143_v17  ;;  %v854_v40 = vand.u32 2147483648, %v2042_v0  ;;  %vm2084_vm8 = vmor %vm118_vm2, %vm119_vm6 }
  0x2c   :  { %v115_v34 = vsub.f32 1.0, %v114_v18  ;;  %v1792_v38 = vpop.eup %1791  ;;  %v134_v41 = vmul.f32 %v133_v33, %v2046_v4  ;;  %v172_v42 = vmul.f32 2.1237322e-06, %v2066_v30  ;;  %v870_v24 = vmul.f32 %v869_v28, %v1950_v27 }
  0x2d   :  { %v76_v39 = vmul.f32 %v1788_v7, %v75_v31  ;;  %v844_v48 = vmul.f32 %v1792_v38, %v2042_v0  ;;  %v2080_v25 = vadd.f32 1.0, %v881_v35  ;;  %vm2088_vm9 = vcmp.eq.f32.partialorder %v852_v32, 8.507059e+37 }
  0x2e   :  { %v116_v44 = vmul.f32 %v1790_v20, %v115_v34  ;;  %v135_v52 = vadd.f32 0.0036580483, %v134_v41  ;;  %v145_v53 = vmul.f32 %v144_v36, %v2046_v4  ;;  %vm849_vm10 = vweird.f32 %v1792_v38 }
  0x2f   :  { %v77_v51 = vadd.f32 %v1788_v7, %v76_v39  ;;  %v845_v54 = vsub.f32 1.0, %v844_v48  ;;  %1793 = vrcp.f32 %v2080_v25  ;;  %v173_v26 = vadd.f32 0.00028619796, %v172_v42  ;;  %vm2106_vm12 = vmor %vm848_vm4, %vm849_vm10 }
  0x30   :  { %v117_v10 = vadd.f32 %v1790_v20, %v116_v44  ;;  %v136_v50 = vmul.f32 %v135_v52, %v2046_v4  ;;  %v183_v55 = vmul.f32 3.8918573e-05, %v2066_v30  ;;  %v146_v59 = vadd.f32 0.014752088, %v145_v53 }
  0x31   :  { %v81_v27 = vsel %vm2074_vm7, %v1788_v7, %v77_v51  ;;  %v846_v58 = vmul.f32 %v1792_v38, %v845_v54  ;;  %v855_v7 = vor.u32 1.1754944e-38, %v854_v40  ;;  %v871_v16 = vadd.f32 1.1283791, %v870_v24 }
  0x32   :  { %v86_v56 = vsel %vm2048_vm1, %v85_v12, %v81_v27  ;;  %v121_v57 = vsel %vm2084_vm8, %v1790_v20, %v117_v10  ;;  %vm888_vm13 = vweird.f32 %v2080_v25  ;;  %v147_v13 = vmul.f32 %v146_v59, %v2046_v4 }
  0x33   :  { %v87_v62 = vmul.f32 %v86_v56, %v62_v2  ;;  %v126_v63 = vsel %vm2060_vm3, %v125_v23, %v121_v57  ;;  %v847_v12 = vadd.f32 %v1792_v38, %v846_v58  ;;  %v892_v2 = vand.u32 2147483647, %v2080_v25 }
  0x34   :  { %v127_v5 = vmul.f32 %v126_v63, %v102_v3  ;;  %v174_v20 = vmul.f32 %v173_v26, %v2066_v30  ;;  %v184_v21 = vadd.f32 0.001143296, %v183_v55  ;;  %v137_v28 = vadd.f32 0.05243302, %v136_v50 }
  0x35   :  { %v1573_v17 = vclamps-f32 %v87_v62, 1.0  ;;  %v1794_v22 = vpop.eup %1793  ;;  %v851_v23 = vsel %vm2106_vm12, %v1792_v38, %v847_v12  ;;  %v148_v18 = vadd.f32 0.112945676, %v147_v13  ;;  %v894_v32 = vand.u32 2147483648, %v2080_v25 }
  0x36   :  { %v1574_v0 = vclamps-f32 %v127_v5, 1.0  ;;  %v856_v3 = vsel %vm2088_vm9, %v855_v7, %v851_v23  ;;  %v884_v31 = vmul.f32 %v1794_v22, %v2080_v25  ;;  %vm889_vm14 = vweird.f32 %v1794_v22 }
  0x37   :  { %v210_v29 = vadd.f32 1.0, %v1573_v17  ;;  %v857_v34 = vmul.f32 %v856_v3, %v2054_v6  ;;  %v149_v35 = vmul.f32 %v148_v18, %v2046_v4  ;;  %v175_v38 = vadd.f32 0.0036580483, %v174_v20  ;;  %vm2136_vm15 = vmor %vm888_vm13, %vm889_vm14 }
  0x38   :  { %v211_v33 = vadd.f32 1.0, %v1574_v0  ;;  %v885_v39 = vsub.f32 1.0, %v884_v31  ;;  %v185_v40 = vmul.f32 %v184_v21, %v2066_v30  ;;  %v138_v42 = vmul.f32 %v137_v28, %v2046_v4 }
  0x39   :  { %v214_v36 = vmul.f32 %v210_v29, %v2009_v46  ;;  %v150_v43 = vadd.f32 0.4994258, %v149_v35  ;;  %v2127_v44 = vmul.f32 0.70710677, %v2036_v60  ;;  %v176_v6 = vmul.f32 %v175_v38, %v2066_v30 }
  0x3a   :  { %v215_v41 = vmul.f32 %v211_v33, %v2015_v49  ;;  %v886_v48 = vmul.f32 %v1794_v22, %v885_v39  ;;  %v186_v24 = vadd.f32 0.014752088, %v185_v40  ;;  %v2131_v51 = vmul.f32 0.70710677, %v2038_v61 }
  0x3b   :  { %v1659_v9 = vclamps-f32 %v857_v34, 1.0  ;;  %v895_v47 = vor.u32 1.1754944e-38, %v894_v32  ;;  %v151_v52 = vmul.f32 %v150_v43, %v2046_v4  ;;  %v872_v53 = vmul.f32 %v871_v16, %v1934_v19 }
  0x3c   :  { %v218_v46 = vpack.c.bf16 %v215_v41, %v214_v36  ;;  %v887_v10 = vadd.f32 %v1794_v22, %v886_v48  ;;  %vm893_vm0 = vcmp.eq.f32.partialorder %v892_v2, 8.507059e+37  ;;  %v187_v54 = vmul.f32 %v186_v24, %v2066_v30 }
  0x3d   :  { %v152_v27 = vadd.f32 1.0, %v151_v52  ;;  %v900_v50 = vmul.f32 %v2127_v44, %v2127_v44  ;;  %v940_v25 = vmul.f32 %v2131_v51, %v2131_v51  ;;  %v139_v55 = vadd.f32 0.18741608, %v138_v42 }
  0x3e   :  { %1585 = vmatmul.msk.bf16.vlgmr.msra.gmra.mxu0 %vm240_vm11, %v218_v46  ;;  %v891_v26 = vsel %vm2136_vm15, %v1794_v22, %v887_v10  ;;  %v177_v56 = vadd.f32 0.05243302, %v176_v6  ;;  %v188_v57 = vadd.f32 0.112945676, %v187_v54  ;;  %v812_v19 = vmul.f32 0.5, %v1920_v14 }
  0x3f   :  { %v896_v58 = vsel %vm893_vm0, %v895_v47, %v891_v26  ;;  %v980_v59 = vadd.f32 1.0, %v1659_v9  ;;  %1795 = vrcp.f32 %v152_v27  ;;  %v813_v1 = vmul.f32 0.5, %v1922_v15 }
  0x40   :  { %v897_v62 = vmul.f32 %v896_v58, %v872_v53  ;;  %v189_v63 = vmul.f32 %v188_v57, %v2066_v30  ;;  %v2153_v7 = vmin.f32 %v900_v50, 16.0  ;;  %v2155_v16 = vmin.f32 %v940_v25, 16.0 }
  0x41   :  { %v140_v12 = vmul.f32 %v139_v55, %v2046_v4  ;;  %v178_v13 = vmul.f32 %v177_v56, %v2066_v30  ;;  %v984_v2 = vmul.f32 %v980_v59, %v812_v19  ;;  %v162_v0 = vand.u32 2147483647, %v152_v27 }
  0x42   :  { %v1660_v5 = vclamps-f32 %v897_v62, 1.0  ;;  %v190_v17 = vadd.f32 0.4994258, %v189_v63  ;;  %v902_v14 = vmul.f32 2.1237322e-06, %v2153_v7  ;;  %vm158_vm1 = vweird.f32 %v152_v27 }
  0x43   :  { %v913_v20 = vmul.f32 3.8918573e-05, %v2153_v7  ;;  %v942_v21 = vmul.f32 2.1237322e-06, %v2155_v16  ;;  %v953_v23 = vmul.f32 3.8918573e-05, %v2155_v16 }
  0x44   :  { %v981_v22 = vadd.f32 1.0, %v1660_v5  ;;  %v191_v15 = vmul.f32 %v190_v17, %v2066_v30  ;;  %v903_v18 = vadd.f32 0.00028619796, %v902_v14  ;;  %v164_v32 = vand.u32 2147483648, %v152_v27 }
  0x45   :  { %v1796_v28 = vpop.eup %1795  ;;  %v914_v4 = vadd.f32 0.001143296, %v913_v20  ;;  %v943_v29 = vadd.f32 0.00028619796, %v942_v21  ;;  %v179_v33 = vadd.f32 0.18741608, %v178_v13 }
  0x46   :  { %v985_v3 = vmul.f32 %v981_v22, %v813_v1  ;;  %v154_v31 = vmul.f32 %v1796_v28, %v152_v27  ;;  %vm159_vm2 = vweird.f32 %v1796_v28  ;;  %v192_v34 = vadd.f32 1.0, %v191_v15 }
  0x47   :  { %v904_v35 = vmul.f32 %v903_v18, %v2153_v7  ;;  %v915_v36 = vmul.f32 %v914_v4, %v2153_v7  ;;  %v944_v40 = vmul.f32 %v943_v29, %v2155_v16  ;;  %v954_v41 = vadd.f32 0.001143296, %v953_v23  ;;  %vm160_vm3 = vmor %vm158_vm1, %vm159_vm2 }
  0x48   :  { %v988_v39 = vpack.c.bf16 %v985_v3, %v984_v2  ;;  %v155_v38 = vsub.f32 1.0, %v154_v31  ;;  %1797 = vrcp.f32 %v192_v34  ;;  %v141_v42 = vadd.f32 1.1283791, %v140_v12 }
  0x49   :  { %v905_v48 = vadd.f32 0.0036580483, %v904_v35  ;;  %v916_v6 = vadd.f32 0.014752088, %v915_v36  ;;  %vm163_vm4 = vcmp.eq.f32.partialorder %v162_v0, 8.507059e+37  ;;  %v165_v24 = vor.u32 1.1754944e-38, %v164_v32 }
  0x4a   :  { %1671 = vmatmul.msk.bf16.vlgmr.msra.gmra.mxu3 %vm240_vm11, %v988_v39  ;;  %v156_v43 = vmul.f32 %v1796_v28, %v155_v38  ;;  %v955_v46 = vmul.f32 %v954_v41, %v2155_v16  ;;  %v180_v49 = vmul.f32 %v179_v33, %v2066_v30  ;;  %v945_v52 = vadd.f32 0.0036580483, %v944_v40 }
  0x4b   :  { %v917_v47 = vmul.f32 %v916_v6, %v2153_v7  ;;  %v906_v53 = vmul.f32 %v905_v48, %v2153_v7  ;;  %v142_v54 = vmul.f32 %v141_v42, %v1998_v37  ;;  %vm198_vm5 = vweird.f32 %v192_v34 }
  0x4c   :  { %v157_v9 = vadd.f32 %v1796_v28, %v156_v43  ;;  %v956_v10 = vadd.f32 0.014752088, %v955_v46  ;;  %v181_v56 = vadd.f32 1.1283791, %v180_v49  ;;  %v946_v19 = vmul.f32 %v945_v52, %v2155_v16 }
  0x4d   :  { %v918_v25 = vadd.f32 0.112945676, %v917_v47  ;;  %v204_v30 = vand.u32 2147483648, %v192_v34  ;;  %v907_v58 = vadd.f32 0.05243302, %v906_v53  ;;  %v44_v31 = vmul.f32 0.5, %v1985_v8 }
  0x4e   :  { %v161_v50 = vsel %vm160_vm3, %v1796_v28, %v157_v9  ;;  %v1798_v26 = vpop.eup %1797  ;;  %v957_v55 = vmul.f32 %v956_v10, %v2155_v16  ;;  %v202_v37 = vand.u32 2147483647, %v192_v34  ;;  %v947_v17 = vadd.f32 0.05243302, %v946_v19 }
  0x4f   :  { %v166_v27 = vsel %vm163_vm4, %v165_v24, %v161_v50  ;;  %v194_v57 = vmul.f32 %v1798_v26, %v192_v34  ;;  %v919_v59 = vmul.f32 %v918_v25, %v2153_v7  ;;  %vm199_vm6 = vweird.f32 %v1798_v26 }
  0x50   :  { %v958_v62 = vadd.f32 0.112945676, %v957_v55  ;;  %v167_v63 = vmul.f32 %v166_v27, %v142_v54  ;;  %vm200_vm7 = vmor %vm198_vm5, %vm199_vm6  ;;  %v205_v2 = vor.u32 1.1754944e-38, %v204_v30  ;;  %v908_v14 = vmul.f32 %v907_v58, %v2153_v7 }
  0x51   :  { %v195_v1 = vsub.f32 1.0, %v194_v57  ;;  %v920_v5 = vadd.f32 0.4994258, %v919_v59  ;;  %v182_v0 = vmul.f32 %v181_v56, %v2006_v45  ;;  %vm203_vm8 = vcmp.eq.f32.partialorder %v202_v37, 8.507059e+37 }
  0x52   :  { %v959_v12 = vmul.f32 %v958_v62, %v2155_v16  ;;  %v1575_v22 = vclamps-f32 %v167_v63, 1.0  ;;  %v948_v4 = vmul.f32 %v947_v17, %v2155_v16  ;;  %v909_v3 = vadd.f32 0.18741608, %v908_v14 }
  0x53   :  { %v196_v13 = vmul.f32 %v1798_v26, %v195_v1  ;;  %v921_v20 = vmul.f32 %v920_v5, %v2153_v7  ;;  %v45_v35 = vmul.f32 0.5, %v1987_v11  ;;  %v814_v62 = vmul.f32 0.5, %v2036_v60 }
  0x54   :  { %v960_v21 = vadd.f32 0.4994258, %v959_v12  ;;  %v212_v33 = vadd.f32 1.0, %v1575_v22  ;;  %v949_v45 = vadd.f32 0.18741608, %v948_v4  ;;  %v910_v39 = vmul.f32 %v909_v3, %v2153_v7 }
  0x55   :  { %v197_v15 = vadd.f32 %v1798_v26, %v196_v13  ;;  %v922_v23 = vadd.f32 1.0, %v921_v20 }
  0x56   :  { %v961_v28 = vmul.f32 %v960_v21, %v2155_v16  ;;  %v216_v40 = vmul.f32 %v212_v33, %v44_v31  ;;  %v950_v6 = vmul.f32 %v949_v45, %v2155_v16  ;;  %v911_v24 = vadd.f32 1.1283791, %v910_v39 }
  0x57   :  { %v201_v18 = vsel %vm200_vm7, %v1798_v26, %v197_v15  ;;  %1799 = vrcp.f32 %v922_v23  ;;  %v934_v48 = vand.u32 2147483648, %v922_v23  ;;  %vm928_vm9 = vweird.f32 %v922_v23  ;;  %v2213_v15 = vld [vmem:[%s2847_s3] ss:$0 sm:$0xff] }
  0x58   :  { %v206_v29 = vsel %vm203_vm8, %v205_v2, %v201_v18  ;;  %v962_v34 = vadd.f32 1.0, %v961_v28  ;;  %v932_v11 = vand.u32 2147483647, %v922_v23  ;;  %v951_v52 = vadd.f32 1.1283791, %v950_v6 }
  0x59   :  { %v207_v32 = vmul.f32 %v206_v29, %v182_v0  ;;  %v935_v7 = vor.u32 1.1754944e-38, %v934_v48  ;;  %v912_v16 = vmul.f32 %v911_v24, %v2127_v44  ;;  %v815_v44 = vmul.f32 0.5, %v2038_v61 }
  0x5a   :  { %1801 = vrcp.f32 %v962_v34  ;;  %v974_v53 = vand.u32 2147483648, %v962_v34  ;;  %vm968_vm13 = vweird.f32 %v962_v34  ;;  %v972_v54 = vand.u32 2147483647, %v962_v34 }
  0x5b   :  { %v1576_v36 = vclamps-f32 %v207_v32, 1.0  ;;  %vm933_vm15 = vcmp.eq.f32.partialorder %v932_v11, 8.507059e+37  ;;  %v952_v56 = vmul.f32 %v951_v52, %v2131_v51  ;;  %v2196_v51 = vld [vmem:[%s2847_s3] ss:$0 sm:$0xff] }
  0x5c   :  { %v975_v27 = vor.u32 1.1754944e-38, %v974_v53  ;;  %vm973_vm1 = vcmp.eq.f32.partialorder %v972_v54, 8.507059e+37 }
  0x5d   :  { %v213_v38 = vadd.f32 1.0, %v1576_v36  ;;  %v1800_v41 = vpop.eup %1799 }
  0x5e   :  { %v924_v43 = vmul.f32 %v1800_v41, %v922_v23  ;;  %vm929_vm10 = vweird.f32 %v1800_v41 }
  0x5f   :  { %v217_v42 = vmul.f32 %v213_v38, %v45_v35  ;;  %vm930_vm12 = vmor %vm928_vm9, %vm929_vm10 }
  0x60   :  { %v1802_v8 = vpop.eup %1801  ;;  %v925_v9 = vsub.f32 1.0, %v924_v43 }
  0x61   :  { %v219_v46 = vpack.c.bf16 %v217_v42, %v216_v40  ;;  %v964_v49 = vmul.f32 %v1802_v8, %v962_v34  ;;  %vm969_vm14 = vweird.f32 %v1802_v8 }
  0x62   :  { %v926_v47 = vmul.f32 %v1800_v41, %v925_v9  ;;  %vm970_vm0 = vmor %vm968_vm13, %vm969_vm14 }
  0x63   :  { %1586 = vmatmul.msk.bf16.gmra.mxu0 %vm240_vm11, %v219_v46  ;;  %v965_v10 = vsub.f32 1.0, %v964_v49 }
  0x64   :  { %v927_v50 = vadd.f32 %v1800_v41, %v926_v47 }
  0x65   :  { %v966_v25 = vmul.f32 %v1802_v8, %v965_v10 }
  0x66   :  { %v931_v26 = vsel %vm930_vm12, %v1800_v41, %v927_v50 }
  0x67   :  { %v936_v55 = vsel %vm933_vm15, %v935_v7, %v931_v26  ;;  %v967_v57 = vadd.f32 %v1802_v8, %v966_v25 }
  0x68   :  { %v937_v19 = vmul.f32 %v936_v55, %v912_v16 }
  0x69   :  { %v971_v30 = vsel %vm970_vm0, %v1802_v8, %v967_v57 }
  0x6a   :  { %v1661_v58 = vclamps-f32 %v937_v19, 1.0  ;;  %v976_v59 = vsel %vm973_vm1, %v975_v27, %v971_v30 }
  0x6b   :  { %v977_v63 = vmul.f32 %v976_v59, %v952_v56 }
  0x6c   :  { %v982_v1 = vadd.f32 1.0, %v1661_v58 }
  0x6d   :  { %v1662_v37 = vclamps-f32 %v977_v63, 1.0 }
  0x6e   :  { %v986_v12 = vmul.f32 %v982_v1, %v814_v62 }
  0x6f   :  { %v983_v5 = vadd.f32 1.0, %v1662_v37 }
  0x71   :  { %v987_v13 = vmul.f32 %v983_v5, %v815_v44 }
  0x73   :  { %v989_v17 = vpack.c.bf16 %v987_v13, %v986_v12 }
  0x75   :  { %1672 = vmatmul.msk.bf16.gmra.mxu3 %vm240_vm11, %v989_v17 }
  0xbb   :  { %v256_v2 = vpop.f32.mrf.mxu0 }
  0xbc   :  { %v2199_v14 = vadd.f32 %v2196_v51, %v256_v2 }
  0xbe   :  { %v2202_v60 = vmul.f32 0.70710677, %v2199_v14 }
  0xc0   :  { %v274_v61 = vmul.f32 %v2202_v60, %v2202_v60 }
  0xc2   :  { %v2206_v20 = vmin.f32 %v274_v61, 16.0 }
  0xc3   :  { %v258_v23 = vpop.f32.mrf.mxu0 }
  0xc4   :  { %v276_v21 = vmul.f32 2.1237322e-06, %v2206_v20  ;;  %v2216_v18 = vadd.f32 %v2196_v51, %v258_v23  ;;  %v287_v4 = vmul.f32 3.8918573e-05, %v2206_v20  ;;  %v1754_v23 = vld [vmem:[%s2849_s4 + $0x38] sm:$0xff] }
  0xc5   :  { %512 = vmatpush.bf16.msra.mxu1 %v1754_v23 }
  0xc6   :  { %v277_v22 = vadd.f32 0.00028619796, %v276_v21  ;;  %v2223_v31 = vmul.f32 0.70710677, %v2216_v18  ;;  %v288_v32 = vadd.f32 0.001143296, %v287_v4 }
  0xc8   :  { %v278_v0 = vmul.f32 %v277_v22, %v2206_v20  ;;  %v314_v34 = vmul.f32 %v2223_v31, %v2223_v31  ;;  %v289_v35 = vmul.f32 %v288_v32, %v2206_v20 }
  0xca   :  { %v279_v29 = vadd.f32 0.0036580483, %v278_v0  ;;  %v2234_v39 = vmin.f32 %v314_v34, 16.0  ;;  %v290_v38 = vadd.f32 0.014752088, %v289_v35 }
  0xcc   :  { %v280_v36 = vmul.f32 %v279_v29, %v2206_v20  ;;  %v316_v41 = vmul.f32 2.1237322e-06, %v2234_v39  ;;  %v291_v43 = vmul.f32 %v290_v38, %v2206_v20  ;;  %v327_v48 = vmul.f32 3.8918573e-05, %v2234_v39 }
  0xcd   :  { %v1025_v28 = vpop.f32.mrf.mxu3 }
  0xce   :  { %v2220_v3 = vadd.f32 %v2213_v15, %v1025_v28  ;;  %v281_v6 = vadd.f32 0.05243302, %v280_v36  ;;  %v317_v9 = vadd.f32 0.00028619796, %v316_v41  ;;  %v292_v11 = vadd.f32 0.112945676, %v291_v43 }
  0xcf   :  { %v328_v49 = vadd.f32 0.001143296, %v327_v48 }
  0xd0   :  { %v2226_v33 = vmul.f32 0.70710677, %v2220_v3  ;;  %v318_v52 = vmul.f32 %v317_v9, %v2234_v39  ;;  %v293_v10 = vmul.f32 %v292_v11, %v2206_v20  ;;  %v282_v54 = vmul.f32 %v281_v6, %v2206_v20 }
  0xd1   :  { %v329_v27 = vmul.f32 %v328_v49, %v2234_v39 }
  0xd2   :  { %v1043_v45 = vmul.f32 %v2226_v33, %v2226_v33  ;;  %v294_v26 = vadd.f32 0.4994258, %v293_v10  ;;  %v319_v57 = vadd.f32 0.0036580483, %v318_v52  ;;  %v283_v58 = vadd.f32 0.18741608, %v282_v54 }
  0xd3   :  { %v330_v1 = vadd.f32 0.014752088, %v329_v27  ;;  %v1772_v10 = vld [vmem:[%s2849_s4 + $0x38] sm:$0xff]  ;;  %v2302_v54 = vmul.f32 0.5, %v2199_v14 }
  0xd4   :  { %v2236_v40 = vmin.f32 %v1043_v45, 16.0  ;;  %v295_v30 = vmul.f32 %v294_v26, %v2206_v20  ;;  %v320_v5 = vmul.f32 %v319_v57, %v2234_v39  ;;  %v284_v4 = vmul.f32 %v283_v58, %v2206_v20  ;;  %v1753_v20 = vld [vmem:[%s2849_s4 + $0x30] sm:$0xff]  ;;  %1281 = vmatpush.bf16.msrb.mxu0 %v1772_v10  ;;  %v1752_v26 = vld [vmem:[%s2849_s4 + $0x28] sm:$0xff] }
  0xd5   :  { %v1027_v42 = vpop.f32.mrf.mxu3  ;;  %v331_v28 = vmul.f32 %v330_v1, %v2234_v39  ;;  %513 = vmatpush.bf16.msra.mxu1 %v1753_v20  ;;  %v2321_v58 = vmul.f32 0.5, %v2220_v3 }
  0xd6   :  { %v1045_v24 = vmul.f32 2.1237322e-06, %v2236_v40  ;;  %v1056_v8 = vmul.f32 3.8918573e-05, %v2236_v40  ;;  %v2244_v46 = vadd.f32 %v2213_v15, %v1027_v42  ;;  %v2265_v12 = vadd.f32 1.0, %v295_v30 }
  0xd7   :  { %v321_v34 = vadd.f32 0.05243302, %v320_v5  ;;  %v332_v48 = vadd.f32 0.112945676, %v331_v28  ;;  %v285_v6 = vadd.f32 1.1283791, %v284_v4 }
  0xd8   :  { %v1046_v47 = vadd.f32 0.00028619796, %v1045_v24  ;;  %v1057_v7 = vadd.f32 0.001143296, %v1056_v8  ;;  %v2248_v53 = vmul.f32 0.70710677, %v2244_v46  ;;  %1803 = vrcp.f32 %v2265_v12 }
  0xd9   :  { %v322_v9 = vmul.f32 %v321_v34, %v2234_v39  ;;  %v333_v27 = vmul.f32 %v332_v48, %v2234_v39  ;;  %v2318_v30 = vmul.f32 %v285_v6, %v2202_v60  ;;  %514 = vmatpush.bf16.msra.mxu1 %v1752_v26  ;;  %v308_v60 = vand.u32 2147483648, %v2265_v12  ;;  %v1751_v5 = vld [vmem:[%s2849_s4 + $0x20] sm:$0xff]  ;;  %v1770_v28 = vld [vmem:[%s2849_s4 + $0x28] sm:$0xff] }
  0xda   :  { %v1047_v16 = vmul.f32 %v1046_v47, %v2236_v40  ;;  %v1058_v50 = vmul.f32 %v1057_v7, %v2236_v40  ;;  %v1083_v25 = vmul.f32 %v2248_v53, %v2248_v53  ;;  %vm302_vm11 = vweird.f32 %v2265_v12 }
  0xdc   :  { %v1048_v55 = vadd.f32 0.0036580483, %v1047_v16  ;;  %v1059_v56 = vadd.f32 0.014752088, %v1058_v50  ;;  %v2257_v19 = vmin.f32 %v1083_v25, 16.0 }
  0xdd   :  { %515 = vmatpush.bf16.msra.mxu1 %v1751_v5 }
  0xde   :  { %v1060_v59 = vmul.f32 %v1059_v56, %v2236_v40  ;;  %v1085_v62 = vmul.f32 2.1237322e-06, %v2257_v19  ;;  %v1096_v63 = vmul.f32 3.8918573e-05, %v2257_v19  ;;  %v1049_v44 = vmul.f32 %v1048_v55, %v2236_v40  ;;  %v2294_v11 = vpop.eup %1803 }
  0xdf   :  { %v323_v56 = vadd.f32 0.18741608, %v322_v9  ;;  %v298_v57 = vmul.f32 %v2294_v11, %v2265_v12  ;;  %vm303_vm3 = vweird.f32 %v2294_v11 }
  0xe0   :  { %v1061_v37 = vadd.f32 0.112945676, %v1060_v59  ;;  %v1086_v13 = vadd.f32 0.00028619796, %v1085_v62  ;;  %v1097_v17 = vadd.f32 0.001143296, %v1096_v63  ;;  %v261_v2 = vpop.f32.mrf.mxu0  ;;  %vm2385_vm6 = vmor %vm302_vm11, %vm303_vm3 }
  0xe1   :  { %v2269_v21 = vadd.f32 %v2196_v51, %v261_v2  ;;  %v1050_v29 = vadd.f32 0.05243302, %v1049_v44  ;;  %v2324_v59 = vmul.f32 0.5, %v2216_v18  ;;  %v1771_v63 = vld [vmem:[%s2849_s4 + $0x30] sm:$0xff]  ;;  %v299_v44 = vsub.f32 1.0, %v298_v57 }
  0xe2   :  { %v1062_v61 = vmul.f32 %v1061_v37, %v2236_v40  ;;  %v1087_v22 = vmul.f32 %v1086_v13, %v2257_v19  ;;  %v1098_v0 = vmul.f32 %v1097_v17, %v2257_v19  ;;  %v2334_v37 = vmul.f32 0.5, %v2244_v46  ;;  %1282 = vmatpush.bf16.msrb.mxu0 %v1771_v63 }
  0xe3   :  { %v2280_v45 = vmul.f32 0.70710677, %v2269_v21  ;;  %v1051_v24 = vmul.f32 %v1050_v29, %v2236_v40  ;;  %v334_v13 = vadd.f32 0.4994258, %v333_v27  ;;  %v306_v29 = vand.u32 2147483647, %v2265_v12 }
  0xe4   :  { %v1063_v32 = vadd.f32 0.4994258, %v1062_v61  ;;  %v1088_v35 = vadd.f32 0.0036580483, %v1087_v22  ;;  %v1099_v36 = vadd.f32 0.014752088, %v1098_v0  ;;  %v324_v61 = vmul.f32 %v323_v56, %v2234_v39 }
  0xe5   :  { %v354_v43 = vmul.f32 %v2280_v45, %v2280_v45  ;;  %v1052_v55 = vadd.f32 0.18741608, %v1051_v24  ;;  %v335_v34 = vmul.f32 %v334_v13, %v2234_v39  ;;  %vm2373_vm5 = vcmp.eq.f32.partialorder %v306_v29, 8.507059e+37  ;;  %v1768_v12 = vld [vmem:[%s2849_s4 + $0x18] sm:$0xff] }
  0xe6   :  { %v1064_v38 = vmul.f32 %v1063_v32, %v2236_v40  ;;  %v1089_v41 = vmul.f32 %v1088_v35, %v2257_v19  ;;  %v1100_v42 = vmul.f32 %v1099_v36, %v2257_v19  ;;  %v309_v32 = vor.u32 1.1754944e-38, %v308_v60  ;;  %1283 = vmatpush.bf16.msrb.mxu0 %v1770_v28  ;;  %v1767_v28 = vld [vmem:[%s2849_s4 + $0x10] sm:$0xff] }
  0xe7   :  { %v2296_v7 = vmin.f32 %v354_v43, 16.0  ;;  %v1053_v2 = vmul.f32 %v1052_v55, %v2236_v40  ;;  %v300_v40 = vmul.f32 %v2294_v11, %v299_v44  ;;  %v2370_v6 = vadd.f32 1.0, %v335_v34  ;;  %v1747_v34 = vld [vmem:[%s2849_s4] sm:$0xff] }
  0xe8   :  { %v2291_v8 = vadd.f32 1.0, %v1064_v38  ;;  %v1090_v49 = vadd.f32 0.05243302, %v1089_v41  ;;  %v1101_v47 = vadd.f32 0.112945676, %v1100_v42  ;;  %v263_v52 = vpop.f32.mrf.mxu0  ;;  %v1750_v41 = vld [vmem:[%s2849_s4 + $0x18] sm:$0xff] }
  0xe9   :  { %v356_v25 = vmul.f32 2.1237322e-06, %v2296_v7  ;;  %v2313_v14 = vadd.f32 %v2196_v51, %v263_v52  ;;  %v367_v43 = vmul.f32 3.8918573e-05, %v2296_v7  ;;  %516 = vmatpush.bf16.msra.mxu1 %v1750_v41  ;;  %v301_v48 = vadd.f32 %v2294_v11, %v300_v40 }
  0xea   :  { %1805 = vrcp.f32 %v2291_v8  ;;  %v1091_v16 = vmul.f32 %v1090_v49, %v2257_v19  ;;  %v1102_v50 = vmul.f32 %v1101_v47, %v2257_v19  ;;  %v1075_v4 = vand.u32 2147483647, %v2291_v8 }
  0xeb   :  { %v357_v51 = vadd.f32 0.00028619796, %v356_v25  ;;  %v2330_v1 = vmul.f32 0.70710677, %v2313_v14  ;;  %v1077_v36 = vand.u32 2147483648, %v2291_v8  ;;  %vm1071_vm4 = vweird.f32 %v2291_v8 }
  0xec   :  { %v1103_v62 = vadd.f32 0.4994258, %v1102_v50  ;;  %v1092_v3 = vadd.f32 0.18741608, %v1091_v16  ;;  %v1054_v24 = vadd.f32 1.1283791, %v1053_v2  ;;  %vm342_vm13 = vweird.f32 %v2370_v6 }
  0xed   :  { %v394_v22 = vmul.f32 %v2330_v1, %v2330_v1  ;;  %v358_v23 = vmul.f32 %v357_v51, %v2296_v7  ;;  %v325_v9 = vadd.f32 1.1283791, %v324_v61  ;;  %v1749_v16 = vld [vmem:[%s2849_s4 + $0x10] sm:$0xff]  ;;  %vm1076_vm8 = vcmp.eq.f32.partialorder %v1075_v4, 8.507059e+37 }
  0xee   :  { %v1104_v18 = vmul.f32 %v1103_v62, %v2257_v19  ;;  %v1093_v38 = vmul.f32 %v1092_v3, %v2257_v19  ;;  %v1769_v19 = vld [vmem:[%s2849_s4 + $0x20] sm:$0xff]  ;;  %v1078_v50 = vor.u32 1.1754944e-38, %v1077_v36  ;;  %v368_v26 = vadd.f32 0.001143296, %v367_v43  ;;  %517 = vmatpush.bf16.msra.mxu1 %v1749_v16 }
  0xef   :  { %v2362_v42 = vmin.f32 %v394_v22, 16.0  ;;  %v359_v20 = vadd.f32 0.0036580483, %v358_v23  ;;  %1284 = vmatpush.bf16.msrb.mxu0 %v1769_v19  ;;  %v305_v62 = vsel %vm2385_vm6, %v2294_v11, %v301_v48  ;;  %v1055_v63 = vmul.f32 %v1054_v24, %v2226_v33 }
  0xf0   :  { %v1806_v17 = vpop.eup %1805  ;;  %v2346_v0 = vadd.f32 1.0, %v1104_v18  ;;  %v1094_v52 = vadd.f32 1.1283791, %v1093_v38  ;;  %v2402_v44 = vmul.f32 %v325_v9, %v2223_v31  ;;  %v1748_v31 = vld [vmem:[%s2849_s4 + $0x8] sm:$0xff]  ;;  %v346_v38 = vand.u32 2147483647, %v2370_v6 }
  0xf1   :  { %v1067_v46 = vmul.f32 %v1806_v17, %v2291_v8  ;;  %vm1072_vm2 = vweird.f32 %v1806_v17  ;;  %v396_v25 = vmul.f32 2.1237322e-06, %v2362_v42  ;;  %v360_v57 = vmul.f32 %v359_v20, %v2296_v7 }
  0xf2   :  { %1807 = vrcp.f32 %v2346_v0  ;;  %v1115_v10 = vand.u32 2147483647, %v2346_v0  ;;  %vm1073_vm7 = vmor %vm1071_vm4, %vm1072_vm2  ;;  %v1117_v56 = vand.u32 2147483648, %v2346_v0  ;;  %v1095_v18 = vmul.f32 %v1094_v52, %v2248_v53  ;;  %518 = vmatpush.bf16.msra.mxu1 %v1748_v31 }
  0xf3   :  { %v1068_v35 = vsub.f32 1.0, %v1067_v46  ;;  %1809 = vrcp.f32 %v2370_v6  ;;  %vm1111_vm9 = vweird.f32 %v2346_v0  ;;  %1285 = vmatpush.bf16.msrb.mxu0 %v1768_v12  ;;  %v397_v11 = vadd.f32 0.00028619796, %v396_v25 }
  0xf4   :  { %vm2407_vm10 = vcmp.eq.f32.partialorder %v1115_v10, 8.507059e+37  ;;  %v369_v53 = vmul.f32 %v368_v26, %v2296_v7  ;;  %v1118_v22 = vor.u32 1.1754944e-38, %v1117_v56  ;;  %v2420_v46 = vadd.f32 0.05243302, %v360_v57 }
  0xf5   :  { %v1069_v39 = vmul.f32 %v1806_v17, %v1068_v35  ;;  %v407_v29 = vmul.f32 3.8918573e-05, %v2362_v42  ;;  %v1766_v35 = vld [vmem:[%s2849_s4 + $0x8] sm:$0xff]  ;;  %v398_v43 = vmul.f32 %v397_v11, %v2362_v42  ;;  %vm2454_vm0 = vcmp.eq.f32.partialorder %v346_v38, 8.507059e+37 }
  0xf6   :  { %v370_v20 = vadd.f32 0.014752088, %v369_v53  ;;  %519 = vmatpush.bf16.msra.mxu1 %v1747_v34 }
  0xf7   :  { %v1070_v47 = vadd.f32 %v1806_v17, %v1069_v39  ;;  %1286 = vmatpush.bf16.msrb.mxu0 %v1767_v28  ;;  %v408_v52 = vadd.f32 0.001143296, %v407_v29 }
  0xf8   :  { %v1808_v27 = vpop.eup %1807  ;;  %v1030_v3 = vpop.f32.mrf.mxu3 }
  0xf9   :  { %v1074_v55 = vsel %vm1073_vm7, %v1806_v17, %v1070_v47  ;;  %v1107_v60 = vmul.f32 %v1808_v27, %v2346_v0  ;;  %v2412_v13 = vadd.f32 %v2213_v15, %v1030_v3  ;;  %v310_v17 = vsel %vm2373_vm5, %v309_v32, %v305_v62  ;;  %v1810_v2 = vpop.eup %1809 }
  0xfa   :  { %v1079_v51 = vsel %vm1076_vm8, %v1078_v50, %v1074_v55  ;;  %vm1112_vm12 = vweird.f32 %v1808_v27  ;;  %v338_v4 = vmul.f32 %v1810_v2, %v2370_v6  ;;  %v311_v36 = vmul.f32 %v310_v17, %v2318_v30  ;;  %v1765_v50 = vld [vmem:[%s2849_s4] sm:$0xff] }
  0xfb   :  { %v1108_v33 = vsub.f32 1.0, %v1107_v60  ;;  %v1080_v61 = vmul.f32 %v1079_v51, %v1055_v63  ;;  %v2423_v23 = vmul.f32 0.70710677, %v2412_v13  ;;  %vm1113_vm14 = vmor %vm1111_vm9, %vm1112_vm12  ;;  %vm343_vm15 = vweird.f32 %v1810_v2  ;;  %1287 = vmatpush.bf16.msrb.mxu0 %v1766_v35 }
  0xfc   :  { %v339_v39 = vsub.f32 1.0, %v338_v4  ;;  %v348_v30 = vand.u32 2147483648, %v2370_v6  ;;  %v371_v47 = vmul.f32 %v370_v20, %v2296_v7  ;;  %v1587_v0 = vclamps-f32 %v311_v36, 1.0  ;;  %vm344_vm1 = vmor %vm342_vm13, %vm343_vm15 }
  0xfd   :  { %v1109_v40 = vmul.f32 %v1808_v27, %v1108_v33  ;;  %v1123_v32 = vmul.f32 %v2423_v23, %v2423_v23  ;;  %v1673_v19 = vclamps-f32 %v1080_v61, 1.0  ;;  %v409_v55 = vmul.f32 %v408_v52, %v2362_v42 }
  0xfe   :  { %v340_v49 = vmul.f32 %v1810_v2, %v339_v39  ;;  %v349_v12 = vor.u32 1.1754944e-38, %v348_v30  ;;  %v399_v3 = vadd.f32 0.0036580483, %v398_v43  ;;  %v434_v31 = vadd.f32 1.0, %v1587_v0 }
  0xff   :  { %v1110_v41 = vadd.f32 %v1808_v27, %v1109_v40  ;;  %v2445_v48 = vmin.f32 %v1123_v32, 16.0  ;;  %v1203_v56 = vadd.f32 1.0, %v1673_v19  ;;  %v410_v60 = vadd.f32 0.014752088, %v409_v55  ;;  %1288 = vmatpush.bf16.msrb.mxu0 %v1765_v50 }
 0x100   :  { %v1032_v9 = vpop.f32.mrf.mxu3  ;;  %v341_v26 = vadd.f32 %v1810_v2, %v340_v49  ;;  %v400_v32 = vmul.f32 %v399_v3, %v2362_v42  ;;  %v362_v43 = vmul.f32 %v2420_v46, %v2296_v7  ;;  %v438_v30 = vmul.f32 %v434_v31, %v2302_v54 }
 0x101   :  { %v1114_v24 = vsel %vm1113_vm14, %v1808_v27, %v1110_v41  ;;  %v2452_v16 = vadd.f32 %v2213_v15, %v1032_v9  ;;  %v372_v27 = vadd.f32 0.112945676, %v371_v47  ;;  %v1125_v57 = vmul.f32 2.1237322e-06, %v2445_v48 }
 0x102   :  { %v1119_v10 = vsel %vm2407_vm10, %v1118_v22, %v1114_v24  ;;  %v345_v63 = vsel %vm344_vm1, %v1810_v2, %v341_v26  ;;  %v411_v17 = vmul.f32 %v410_v60, %v2362_v42  ;;  %v1207_v53 = vmul.f32 %v1203_v56, %v2321_v58 }
 0x103   :  { %v1120_v25 = vmul.f32 %v1119_v10, %v1095_v18  ;;  %v2464_v15 = vmul.f32 0.70710677, %v2452_v16  ;;  %v373_v51 = vmul.f32 %v372_v27, %v2296_v7  ;;  %v350_v5 = vsel %vm2454_vm0, %v349_v12, %v345_v63 }
 0x104   :  { %v351_v11 = vmul.f32 %v350_v5, %v2402_v44  ;;  %v1126_v2 = vadd.f32 0.00028619796, %v1125_v57  ;;  %v1136_v22 = vmul.f32 3.8918573e-05, %v2445_v48  ;;  %v412_v29 = vadd.f32 0.112945676, %v411_v17 }
 0x105   :  { %v1674_v62 = vclamps-f32 %v1120_v25, 1.0  ;;  %v1163_v18 = vmul.f32 %v2464_v15, %v2464_v15  ;;  %v374_v6 = vadd.f32 0.4994258, %v373_v51  ;;  %v401_v9 = vadd.f32 0.05243302, %v400_v32 }
 0x106   :  { %v1588_v40 = vclamps-f32 %v351_v11, 1.0  ;;  %v1137_v34 = vadd.f32 0.001143296, %v1136_v22  ;;  %v413_v41 = vmul.f32 %v412_v29, %v2362_v42  ;;  %v1127_v19 = vmul.f32 %v1126_v2, %v2445_v48 }
 0x107   :  { %v1204_v33 = vadd.f32 1.0, %v1674_v62  ;;  %v2477_v61 = vmin.f32 %v1163_v18, 16.0  ;;  %v375_v4 = vmul.f32 %v374_v6, %v2296_v7  ;;  %v363_v8 = vadd.f32 0.18741608, %v362_v43 }
 0x108   :  { %v435_v36 = vadd.f32 1.0, %v1588_v40  ;;  %v1138_v39 = vmul.f32 %v1137_v34, %v2445_v48  ;;  %v414_v49 = vadd.f32 0.4994258, %v413_v41  ;;  %v1128_v50 = vadd.f32 0.0036580483, %v1127_v19 }
 0x109   :  { %v1208_v28 = vmul.f32 %v1204_v33, %v2334_v37  ;;  %v1165_v44 = vmul.f32 2.1237322e-06, %v2477_v61  ;;  %v1176_v35 = vmul.f32 3.8918573e-05, %v2477_v61  ;;  %v376_v38 = vadd.f32 1.0, %v375_v4 }
 0x10a   :  { %v439_v24 = vmul.f32 %v435_v36, %v2324_v59  ;;  %v1139_v10 = vadd.f32 0.014752088, %v1138_v39  ;;  %v415_v0 = vmul.f32 %v414_v49, %v2362_v42  ;;  %v402_v59 = vmul.f32 %v401_v9, %v2362_v42 }
 0x10b   :  { %v1211_v58 = vpack.c.bf16 %v1208_v28, %v1207_v53  ;;  %v1166_v37 = vadd.f32 0.00028619796, %v1165_v44  ;;  %v1177_v20 = vadd.f32 0.001143296, %v1176_v35  ;;  %1811 = vrcp.f32 %v376_v38 }
 0x10c   :  { %v442_v52 = vpack.c.bf16 %v439_v24, %v438_v30  ;;  %v1140_v25 = vmul.f32 %v1139_v10, %v2445_v48  ;;  %v416_v26 = vadd.f32 1.0, %v415_v0  ;;  %v364_v62 = vmul.f32 %v363_v8, %v2296_v7 }
 0x10d   :  { %1289 = vmatmul.bf16.vlgmr.msrb.gmra.mxu0 %v1211_v58  ;;  %v1167_v47 = vmul.f32 %v1166_v37, %v2477_v61  ;;  %v1178_v46 = vmul.f32 %v1177_v20, %v2477_v61  ;;  %v1129_v63 = vmul.f32 %v1128_v50, %v2445_v48  ;;  %v403_v51 = vadd.f32 0.18741608, %v402_v59 }
 0x10e   :  { %520 = vmatmul.bf16.vlgmr.msra.gmra.mxu1 %v442_v52  ;;  %v1141_v56 = vadd.f32 0.112945676, %v1140_v25  ;;  %1813 = vrcp.f32 %v416_v26  ;;  %v388_v5 = vand.u32 2147483648, %v376_v38  ;;  %v386_v11 = vand.u32 2147483647, %v376_v38 }
 0x10f   :  { %v1179_v54 = vadd.f32 0.014752088, %v1178_v46  ;;  %v1168_v55 = vadd.f32 0.0036580483, %v1167_v47  ;;  %v365_v17 = vadd.f32 1.1283791, %v364_v62  ;;  %v404_v7 = vmul.f32 %v403_v51, %v2362_v42 }
 0x110   :  { %v1142_v3 = vmul.f32 %v1141_v56, %v2445_v48  ;;  %v1130_v53 = vadd.f32 0.05243302, %v1129_v63  ;;  %vm382_vm2 = vweird.f32 %v376_v38  ;;  %v389_v29 = vor.u32 1.1754944e-38, %v388_v5 }
 0x111   :  { %v1812_v27 = vpop.eup %1811  ;;  %v1180_v57 = vmul.f32 %v1179_v54, %v2477_v61  ;;  %v1169_v18 = vmul.f32 %v1168_v55, %v2477_v61  ;;  %vm387_vm4 = vcmp.eq.f32.partialorder %v386_v11, 8.507059e+37  ;;  %v366_v42 = vmul.f32 %v365_v17, %v2280_v45 }
 0x112   :  { %v378_v12 = vmul.f32 %v1812_v27, %v376_v38  ;;  %vm383_vm11 = vweird.f32 %v1812_v27  ;;  %v1143_v6 = vadd.f32 0.4994258, %v1142_v3  ;;  %v1131_v35 = vmul.f32 %v1130_v53, %v2445_v48 }
 0x113   :  { %v1181_v31 = vadd.f32 0.112945676, %v1180_v57  ;;  %v1170_v4 = vadd.f32 0.05243302, %v1169_v18  ;;  %vm384_vm3 = vmor %vm382_vm2, %vm383_vm11  ;;  %v405_v43 = vadd.f32 1.1283791, %v404_v7  ;;  %vm422_vm6 = vweird.f32 %v416_v26 }
 0x114   :  { %v379_v60 = vsub.f32 1.0, %v378_v12  ;;  %v1144_v28 = vmul.f32 %v1143_v6, %v2445_v48  ;;  %v1814_v40 = vpop.eup %1813  ;;  %v426_v39 = vand.u32 2147483647, %v416_v26  ;;  %v428_v20 = vand.u32 2147483648, %v416_v26 }
 0x115   :  { %v1182_v2 = vmul.f32 %v1181_v31, %v2477_v61  ;;  %v418_v34 = vmul.f32 %v1814_v40, %v416_v26  ;;  %v1171_v37 = vmul.f32 %v1170_v4, %v2477_v61  ;;  %vm423_vm5 = vweird.f32 %v1814_v40 }
 0x116   :  { %v380_v33 = vmul.f32 %v1812_v27, %v379_v60  ;;  %v1145_v58 = vadd.f32 1.0, %v1144_v28  ;;  %v1132_v9 = vadd.f32 0.18741608, %v1131_v35  ;;  %vm424_vm7 = vmor %vm422_vm6, %vm423_vm5  ;;  %v429_v52 = vor.u32 1.1754944e-38, %v428_v20 }
 0x117   :  { %v1183_v32 = vadd.f32 0.4994258, %v1182_v2  ;;  %v419_v38 = vsub.f32 1.0, %v418_v34  ;;  %v1172_v47 = vadd.f32 0.18741608, %v1171_v37  ;;  %v406_v45 = vmul.f32 %v405_v43, %v2330_v1 }
 0x118   :  { %v381_v22 = vadd.f32 %v1812_v27, %v380_v33  ;;  %1815 = vrcp.f32 %v1145_v58  ;;  %vm427_vm8 = vcmp.eq.f32.partialorder %v426_v39, 8.507059e+37  ;;  %v1133_v8 = vmul.f32 %v1132_v9, %v2445_v48 }
 0x119   :  { %v1184_v41 = vmul.f32 %v1183_v32, %v2477_v61  ;;  %v420_v30 = vmul.f32 %v1814_v40, %v419_v38  ;;  %v1173_v59 = vmul.f32 %v1172_v47, %v2477_v61  ;;  %v268_v26 = vmul.f32 0.5, %v2269_v21  ;;  %v2526_v38 = vld [vmem:[%s2848_s5] ss:$0 sm:$0xff] }
 0x11a   :  { %v385_v44 = vsel %vm384_vm3, %v1812_v27, %v381_v22  ;;  %v1134_v12 = vadd.f32 1.1283791, %v1133_v8  ;;  %v269_v1 = vmul.f32 0.5, %v2313_v14  ;;  %v1157_v62 = vand.u32 2147483648, %v1145_v58 }
 0x11b   :  { %v390_v36 = vsel %vm387_vm4, %v389_v29, %v385_v44  ;;  %v1185_v24 = vadd.f32 1.0, %v1184_v41  ;;  %v421_v49 = vadd.f32 %v1814_v40, %v420_v30  ;;  %v1155_v48 = vand.u32 2147483647, %v1145_v58 }
 0x11c   :  { %v391_v19 = vmul.f32 %v390_v36, %v366_v42  ;;  %v1174_v3 = vadd.f32 1.1283791, %v1173_v59  ;;  %vm1151_vm10 = vweird.f32 %v1145_v58  ;;  %v1158_v21 = vor.u32 1.1754944e-38, %v1157_v62 }
 0x11d   :  { %1817 = vrcp.f32 %v1185_v24  ;;  %v425_v46 = vsel %vm424_vm7, %v1814_v40, %v421_v49  ;;  %v1197_v33 = vand.u32 2147483648, %v1185_v24  ;;  %v1195_v6 = vand.u32 2147483647, %v1185_v24 }
 0x11e   :  { %v1589_v10 = vclamps-f32 %v391_v19, 1.0  ;;  %v1816_v0 = vpop.eup %1815  ;;  %v430_v50 = vsel %vm427_vm8, %v429_v52, %v425_v46  ;;  %v1135_v14 = vmul.f32 %v1134_v12, %v2423_v23  ;;  %vm1156_vm14 = vcmp.eq.f32.partialorder %v1155_v48, 8.507059e+37 }
 0x11f   :  { %v431_v25 = vmul.f32 %v430_v50, %v406_v45  ;;  %v1147_v54 = vmul.f32 %v1816_v0, %v1145_v58  ;;  %vm1152_vm9 = vweird.f32 %v1816_v0  ;;  %vm1191_vm15 = vweird.f32 %v1185_v24 }
 0x120   :  { %v436_v56 = vadd.f32 1.0, %v1589_v10  ;;  %vm1153_vm12 = vmor %vm1151_vm10, %vm1152_vm9  ;;  %v1198_v28 = vor.u32 1.1754944e-38, %v1197_v33  ;;  %v1175_v40 = vmul.f32 %v1174_v3, %v2464_v15  ;;  %vm1196_vm1 = vcmp.eq.f32.partialorder %v1195_v6, 8.507059e+37  ;;  %v2521_v15 = vld [vmem:[%s2848_s5] ss:$0 sm:$0xff] }
 0x121   :  { %v1590_v55 = vclamps-f32 %v431_v25, 1.0  ;;  %v1148_v57 = vsub.f32 1.0, %v1147_v54  ;;  %v1037_v23 = vmul.f32 0.5, %v2412_v13  ;;  %v1038_v36 = vmul.f32 0.5, %v2452_v16 }
 0x122   :  { %v440_v5 = vmul.f32 %v436_v56, %v268_v26 }
 0x123   :  { %v1818_v27 = vpop.eup %1817  ;;  %v437_v51 = vadd.f32 1.0, %v1590_v55  ;;  %v1149_v60 = vmul.f32 %v1816_v0, %v1148_v57 }
 0x124   :  { %v1187_v63 = vmul.f32 %v1818_v27, %v1185_v24  ;;  %vm1192_vm13 = vweird.f32 %v1818_v27 }
 0x125   :  { %v441_v61 = vmul.f32 %v437_v51, %v269_v1  ;;  %v1150_v31 = vadd.f32 %v1816_v0, %v1149_v60  ;;  %vm1193_vm0 = vmor %vm1191_vm15, %vm1192_vm13 }
 0x126   :  { %v1188_v18 = vsub.f32 1.0, %v1187_v63 }
 0x127   :  { %v443_v17 = vpack.c.bf16 %v441_v61, %v440_v5  ;;  %v1154_v53 = vsel %vm1153_vm12, %v1816_v0, %v1150_v31 }
 0x128   :  { %v1189_v11 = vmul.f32 %v1818_v27, %v1188_v18  ;;  %v1159_v2 = vsel %vm1156_vm14, %v1158_v21, %v1154_v53 }
 0x129   :  { %525 = vmatmul.bf16.gmra.mxu1 %v443_v17  ;;  %v1160_v22 = vmul.f32 %v1159_v2, %v1135_v14 }
 0x12a   :  { %v1190_v7 = vadd.f32 %v1818_v27, %v1189_v11 }
 0x12b   :  { %v1675_v29 = vclamps-f32 %v1160_v22, 1.0 }
 0x12c   :  { %v1194_v4 = vsel %vm1193_vm0, %v1818_v27, %v1190_v7 }
 0x12d   :  { %v1199_v32 = vsel %vm1196_vm1, %v1198_v28, %v1194_v4  ;;  %v1205_v35 = vadd.f32 1.0, %v1675_v29 }
 0x12e   :  { %v1200_v44 = vmul.f32 %v1199_v32, %v1175_v40 }
 0x12f   :  { %v1209_v41 = vmul.f32 %v1205_v35, %v1037_v23 }
 0x130   :  { %v1676_v34 = vclamps-f32 %v1200_v44, 1.0 }
 0x132   :  { %v1206_v58 = vadd.f32 1.0, %v1676_v34 }
 0x134   :  { %v1210_v42 = vmul.f32 %v1206_v58, %v1038_v36 }
 0x136   :  { %v1212_v43 = vpack.c.bf16 %v1210_v42, %v1209_v41 }
 0x138   :  { %1294 = vmatmul.bf16.gmra.mxu0 %v1212_v43 }
 0x18a   :  { %v1290_v37 = vpop.f32.mrf.mxu0 }
 0x18b   :  { %v2529_v13 = vadd.f32 %v2526_v38, %v1290_v37  ;;  %v521_v16 = vpop.f32.mrf.mxu1 }
 0x18c   :  { %v2532_v39 = vadd.f32 %v2521_v15, %v521_v16  ;;  %v1762_v16 = vld [vmem:[%s2851_s6 + $0x38] sm:$0xff] }
 0x18d   :  { %v2535_v20 = vmul.f32 0.70710677, %v2529_v13  ;;  %777 = vmatpush.bf16.msra.mxu2 %v1762_v16 }
 0x18e   :  { %v2538_v19 = vmul.f32 0.70710677, %v2532_v39 }
 0x18f   :  { %v1308_v30 = vmul.f32 %v2535_v20, %v2535_v20 }
 0x190   :  { %v539_v24 = vmul.f32 %v2538_v19, %v2538_v19 }
 0x191   :  { %v2544_v9 = vmin.f32 %v1308_v30, 16.0 }
 0x192   :  { %v2546_v49 = vmin.f32 %v539_v24, 16.0  ;;  %v1292_v50 = vpop.f32.mrf.mxu0 }
 0x193   :  { %v1310_v47 = vmul.f32 2.1237322e-06, %v2544_v9  ;;  %v1321_v52 = vmul.f32 3.8918573e-05, %v2544_v9  ;;  %v523_v45 = vpop.f32.mrf.mxu1  ;;  %v2555_v25 = vadd.f32 %v2526_v38, %v1292_v50  ;;  %v1761_v50 = vld [vmem:[%s2851_s6 + $0x30] sm:$0xff] }
 0x194   :  { %v541_v10 = vmul.f32 2.1237322e-06, %v2546_v49  ;;  %v2552_v8 = vadd.f32 %v2521_v15, %v523_v45  ;;  %v552_v54 = vmul.f32 3.8918573e-05, %v2546_v49  ;;  %778 = vmatpush.bf16.msra.mxu2 %v1761_v50 }
 0x195   :  { %v1311_v46 = vadd.f32 0.00028619796, %v1310_v47  ;;  %v1322_v0 = vadd.f32 0.001143296, %v1321_v52  ;;  %v2564_v56 = vmul.f32 0.70710677, %v2555_v25 }
 0x196   :  { %v542_v59 = vadd.f32 0.00028619796, %v541_v10  ;;  %v2561_v55 = vmul.f32 0.70710677, %v2552_v8  ;;  %v553_v12 = vadd.f32 0.001143296, %v552_v54 }
 0x197   :  { %v1312_v27 = vmul.f32 %v1311_v46, %v2544_v9  ;;  %v1323_v26 = vmul.f32 %v1322_v0, %v2544_v9  ;;  %v1348_v62 = vmul.f32 %v2564_v56, %v2564_v56 }
 0x198   :  { %v579_v1 = vmul.f32 %v2561_v55, %v2561_v55  ;;  %v543_v63 = vmul.f32 %v542_v59, %v2546_v49  ;;  %v554_v48 = vmul.f32 %v553_v12, %v2546_v49 }
 0x199   :  { %v1324_v57 = vadd.f32 0.014752088, %v1323_v26  ;;  %v1313_v51 = vadd.f32 0.0036580483, %v1312_v27  ;;  %v2575_v18 = vmin.f32 %v1348_v62, 16.0 }
 0x19a   :  { %v2573_v3 = vmin.f32 %v579_v1, 16.0  ;;  %v555_v61 = vadd.f32 0.014752088, %v554_v48  ;;  %v544_v11 = vadd.f32 0.0036580483, %v543_v63  ;;  %v1780_v63 = vld [vmem:[%s2851_s6 + $0x38] sm:$0xff] }
 0x19b   :  { %v1325_v60 = vmul.f32 %v1324_v57, %v2544_v9  ;;  %v1350_v33 = vmul.f32 2.1237322e-06, %v2575_v18  ;;  %v1361_v21 = vmul.f32 3.8918573e-05, %v2575_v18  ;;  %v1314_v6 = vmul.f32 %v1313_v51, %v2544_v9  ;;  %1546 = vmatpush.bf16.msrb.mxu3 %v1780_v63 }
 0x19c   :  { %v581_v31 = vmul.f32 2.1237322e-06, %v2573_v3  ;;  %v556_v17 = vmul.f32 %v555_v61, %v2546_v49  ;;  %v592_v32 = vmul.f32 3.8918573e-05, %v2573_v3  ;;  %v545_v44 = vmul.f32 %v544_v11, %v2546_v49 }
 0x19d   :  { %v1326_v5 = vadd.f32 0.112945676, %v1325_v60  ;;  %v1351_v2 = vadd.f32 0.00028619796, %v1350_v33  ;;  %v1362_v7 = vadd.f32 0.001143296, %v1361_v21 }
 0x19e   :  { %v582_v53 = vadd.f32 0.00028619796, %v581_v31  ;;  %v557_v28 = vadd.f32 0.112945676, %v556_v17  ;;  %v1315_v34 = vadd.f32 0.05243302, %v1314_v6 }
 0x19f   :  { %v1327_v14 = vmul.f32 %v1326_v5, %v2544_v9  ;;  %v1352_v4 = vmul.f32 %v1351_v2, %v2575_v18  ;;  %v1363_v29 = vmul.f32 %v1362_v7, %v2575_v18  ;;  %v593_v30 = vadd.f32 0.001143296, %v592_v32  ;;  %v1760_v31 = vld [vmem:[%s2851_s6 + $0x28] sm:$0xff]  ;;  %v1759_v32 = vld [vmem:[%s2851_s6 + $0x20] sm:$0xff] }
 0x1a0   :  { %v583_v40 = vmul.f32 %v582_v53, %v2573_v3  ;;  %v558_v23 = vmul.f32 %v557_v28, %v2546_v49  ;;  %v546_v24 = vadd.f32 0.05243302, %v545_v44  ;;  %v1316_v47 = vmul.f32 %v1315_v34, %v2544_v9  ;;  %779 = vmatpush.bf16.msra.mxu2 %v1760_v31  ;;  %v1779_v53 = vld [vmem:[%s2851_s6 + $0x30] sm:$0xff] }
 0x1a1   :  { %v1328_v22 = vadd.f32 0.4994258, %v1327_v14  ;;  %v1353_v36 = vadd.f32 0.0036580483, %v1352_v4  ;;  %v1364_v58 = vadd.f32 0.014752088, %v1363_v29  ;;  %v594_v46 = vmul.f32 %v593_v30, %v2573_v3  ;;  %1547 = vmatpush.bf16.msrb.mxu3 %v1779_v53 }
 0x1a2   :  { %v559_v42 = vadd.f32 0.4994258, %v558_v23  ;;  %v584_v43 = vadd.f32 0.0036580483, %v583_v40  ;;  %v547_v59 = vmul.f32 %v546_v24, %v2546_v49  ;;  %v1317_v27 = vadd.f32 0.18741608, %v1316_v47 }
 0x1a3   :  { %v1329_v35 = vmul.f32 %v1328_v22, %v2544_v9  ;;  %v1365_v37 = vmul.f32 %v1364_v58, %v2575_v18  ;;  %v1354_v52 = vmul.f32 %v1353_v36, %v2575_v18  ;;  %v595_v12 = vadd.f32 0.014752088, %v594_v46  ;;  %v1758_v47 = vld [vmem:[%s2851_s6 + $0x18] sm:$0xff] }
 0x1a4   :  { %v560_v45 = vmul.f32 %v559_v42, %v2546_v49  ;;  %v585_v0 = vmul.f32 %v584_v43, %v2573_v3  ;;  %v548_v33 = vadd.f32 0.18741608, %v547_v59  ;;  %v1318_v21 = vmul.f32 %v1317_v27, %v2544_v9  ;;  %780 = vmatpush.bf16.msra.mxu2 %v1759_v32  ;;  %v1778_v43 = vld [vmem:[%s2851_s6 + $0x28] sm:$0xff]  ;;  %v1777_v27 = vld [vmem:[%s2851_s6 + $0x20] sm:$0xff]  ;;  %v1775_v32 = vld [vmem:[%s2851_s6 + $0x10] sm:$0xff] }
 0x1a5   :  { %v2590_v41 = vadd.f32 1.0, %v1329_v35  ;;  %v1366_v10 = vadd.f32 0.112945676, %v1365_v37  ;;  %v1355_v1 = vadd.f32 0.05243302, %v1354_v52  ;;  %v596_v48 = vmul.f32 %v595_v12, %v2573_v3  ;;  %1548 = vmatpush.bf16.msrb.mxu3 %v1778_v43 }
 0x1a6   :  { %v2605_v54 = vadd.f32 1.0, %v560_v45  ;;  %v526_v57 = vpop.f32.mrf.mxu1  ;;  %v586_v61 = vadd.f32 0.05243302, %v585_v0  ;;  %v549_v44 = vmul.f32 %v548_v33, %v2546_v49  ;;  %v1319_v34 = vadd.f32 1.1283791, %v1318_v21 }
 0x1a7   :  { %1819 = vrcp.f32 %v2590_v41  ;;  %v1367_v26 = vmul.f32 %v1366_v10, %v2575_v18  ;;  %v2610_v62 = vadd.f32 %v2521_v15, %v526_v57  ;;  %v1356_v17 = vmul.f32 %v1355_v1, %v2575_v18 }
 0x1a8   :  { %1821 = vrcp.f32 %v2605_v54  ;;  %v1342_v2 = vand.u32 2147483648, %v2590_v41  ;;  %v597_v22 = vadd.f32 0.112945676, %v596_v48  ;;  %v1340_v4 = vand.u32 2147483647, %v2590_v41  ;;  %781 = vmatpush.bf16.msra.mxu2 %v1758_v47 }
 0x1a9   :  { %v1368_v60 = vadd.f32 0.4994258, %v1367_v26  ;;  %v2624_v6 = vmul.f32 0.70710677, %v2610_v62  ;;  %v587_v29 = vmul.f32 %v586_v61, %v2573_v3  ;;  %vm1336_vm2 = vweird.f32 %v2590_v41  ;;  %1549 = vmatpush.bf16.msrb.mxu3 %v1777_v27 }
 0x1aa   :  { %v1357_v36 = vadd.f32 0.18741608, %v1356_v17  ;;  %v2654_v49 = vmul.f32 0.5, %v2529_v13  ;;  %v598_v16 = vmul.f32 %v597_v22, %v2573_v3  ;;  %vm1341_vm4 = vcmp.eq.f32.partialorder %v1340_v4, 8.507059e+37 }
 0x1ab   :  { %v1369_v11 = vmul.f32 %v1368_v60, %v2575_v18  ;;  %v619_v9 = vmul.f32 %v2624_v6, %v2624_v6  ;;  %v2667_v46 = vadd.f32 1.1283791, %v549_v44  ;;  %v1320_v0 = vmul.f32 %v1319_v34, %v2535_v20  ;;  %v1757_v60 = vld [vmem:[%s2851_s6 + $0x10] sm:$0xff] }
 0x1ac   :  { %v599_v10 = vadd.f32 0.4994258, %v598_v16  ;;  %v1358_v50 = vmul.f32 %v1357_v36, %v2575_v18  ;;  %vm567_vm5 = vweird.f32 %v2605_v54  ;;  %v571_v48 = vand.u32 2147483647, %v2605_v54  ;;  %782 = vmatpush.bf16.msra.mxu2 %v1757_v60  ;;  %v1773_v60 = vld [vmem:[%s2851_s6] sm:$0xff] }
 0x1ad   :  { %v1820_v51 = vpop.eup %1819  ;;  %v2631_v7 = vadd.f32 1.0, %v1369_v11  ;;  %v2645_v58 = vmin.f32 %v619_v9, 16.0  ;;  %v573_v33 = vand.u32 2147483648, %v2605_v54 }
 0x1ae   :  { %v1332_v5 = vmul.f32 %v1820_v51, %v2590_v41  ;;  %v2635_v28 = vpop.eup %1821  ;;  %vm1337_vm11 = vweird.f32 %v1820_v51  ;;  %v528_v35 = vpop.f32.mrf.mxu1  ;;  %v1343_v41 = vor.u32 1.1754944e-38, %v1342_v2  ;;  %v600_v20 = vmul.f32 %v599_v10, %v2573_v3 }
 0x1af   :  { %1823 = vrcp.f32 %v2631_v7  ;;  %v2648_v42 = vadd.f32 %v2521_v15, %v528_v35  ;;  %vm1338_vm3 = vmor %vm1336_vm2, %vm1337_vm11  ;;  %v563_v37 = vmul.f32 %v2635_v28, %v2605_v54  ;;  %v588_v15 = vadd.f32 0.18741608, %v587_v29  ;;  %v1756_v29 = vld [vmem:[%s2851_s6 + $0x8] sm:$0xff] }
 0x1b0   :  { %v1333_v14 = vsub.f32 1.0, %v1332_v5  ;;  %v621_v24 = vmul.f32 2.1237322e-06, %v2645_v58  ;;  %v1359_v21 = vadd.f32 1.1283791, %v1358_v50  ;;  %v2698_v17 = vadd.f32 1.0, %v600_v20  ;;  %783 = vmatpush.bf16.msra.mxu2 %v1756_v29 }
 0x1b1   :  { %v2665_v52 = vmul.f32 0.70710677, %v2648_v42  ;;  %v564_v45 = vsub.f32 1.0, %v563_v37  ;;  %v589_v63 = vmul.f32 %v588_v15, %v2573_v3  ;;  %v1382_v3 = vand.u32 2147483648, %v2631_v7 }
 0x1b2   :  { %v1334_v40 = vmul.f32 %v1820_v51, %v1333_v14  ;;  %v622_v5 = vadd.f32 0.00028619796, %v621_v24  ;;  %v1776_v14 = vld [vmem:[%s2851_s6 + $0x18] sm:$0xff]  ;;  %vm568_vm6 = vweird.f32 %v2635_v28  ;;  %v632_v9 = vmul.f32 3.8918573e-05, %v2645_v58 }
 0x1b3   :  { %v659_v12 = vmul.f32 %v2665_v52, %v2665_v52  ;;  %v565_v1 = vmul.f32 %v2635_v28, %v564_v45  ;;  %v1380_v4 = vand.u32 2147483647, %v2631_v7  ;;  %1550 = vmatpush.bf16.msrb.mxu3 %v1776_v14  ;;  %v590_v44 = vadd.f32 1.1283791, %v589_v63  ;;  %vm2723_vm9 = vmor %vm567_vm5, %vm568_vm6  ;;  %v1774_v45 = vld [vmem:[%s2851_s6 + $0x8] sm:$0xff] }
 0x1b4   :  { %v1335_v23 = vadd.f32 %v1820_v51, %v1334_v40  ;;  %v623_v34 = vmul.f32 %v622_v5, %v2645_v58  ;;  %1825 = vrcp.f32 %v2698_v17  ;;  %vm1376_vm8 = vweird.f32 %v2631_v7 }
 0x1b5   :  { %v1295_v59 = vpop.f32.mrf.mxu0  ;;  %v1824_v26 = vpop.eup %1823  ;;  %v2691_v31 = vmin.f32 %v659_v12, 16.0  ;;  %v566_v2 = vadd.f32 %v2635_v28, %v565_v1  ;;  %v1383_v36 = vor.u32 1.1754944e-38, %v1382_v3  ;;  %v574_v16 = vor.u32 1.1754944e-38, %v573_v33 }
 0x1b6   :  { %v1339_v30 = vsel %vm1338_vm3, %v1820_v51, %v1335_v23  ;;  %v2676_v57 = vadd.f32 %v2526_v38, %v1295_v59  ;;  %v1372_v51 = vmul.f32 %v1824_v26, %v2631_v7  ;;  %vm1377_vm7 = vweird.f32 %v1824_v26 }
 0x1b7   :  { %v1344_v13 = vsel %vm1341_vm4, %v1343_v41, %v1339_v30  ;;  %v661_v35 = vmul.f32 2.1237322e-06, %v2691_v31  ;;  %v1755_v41 = vld [vmem:[%s2851_s6] sm:$0xff]  ;;  %vm1378_vm10 = vmor %vm1376_vm8, %vm1377_vm7  ;;  %v570_v15 = vsel %vm2723_vm9, %v2635_v28, %v566_v2  ;;  %v633_v24 = vadd.f32 0.001143296, %v632_v9  ;;  %1551 = vmatpush.bf16.msrb.mxu3 %v1775_v32 }
 0x1b8   :  { %v1345_v18 = vmul.f32 %v1344_v13, %v1320_v0  ;;  %v2689_v61 = vmul.f32 0.70710677, %v2676_v57  ;;  %v1373_v11 = vsub.f32 1.0, %v1372_v51  ;;  %v1360_v54 = vmul.f32 %v1359_v21, %v2564_v56  ;;  %784 = vmatpush.bf16.msra.mxu2 %v1755_v41 }
 0x1b9   :  { %vm1381_vm12 = vcmp.eq.f32.partialorder %v1380_v4, 8.507059e+37  ;;  %v624_v0 = vadd.f32 0.0036580483, %v623_v34  ;;  %v662_v50 = vadd.f32 0.00028619796, %v661_v35  ;;  %vm572_vm13 = vcmp.eq.f32.partialorder %v571_v48, 8.507059e+37 }
 0x1ba   :  { %v1388_v53 = vmul.f32 %v2689_v61, %v2689_v61  ;;  %v1709_v22 = vclamps-f32 %v1345_v18, 1.0  ;;  %v1374_v40 = vmul.f32 %v1824_v26, %v1373_v11  ;;  %v575_v27 = vsel %vm572_vm13, %v574_v16, %v570_v15  ;;  %v1826_v56 = vpop.eup %1825 }
 0x1bb   :  { %v591_v12 = vmul.f32 %v590_v44, %v2561_v55  ;;  %v634_v20 = vmul.f32 %v633_v24, %v2645_v58  ;;  %1552 = vmatpush.bf16.msrb.mxu3 %v1774_v45  ;;  %v603_v51 = vmul.f32 %v1826_v56, %v2698_v17  ;;  %v663_v55 = vmul.f32 %v662_v50, %v2691_v31 }
 0x1bc   :  { %v1375_v23 = vadd.f32 %v1824_v26, %v1374_v40  ;;  %v2728_v30 = vmin.f32 %v1388_v53, 16.0  ;;  %v1468_v47 = vadd.f32 1.0, %v1709_v22  ;;  %v611_v48 = vand.u32 2147483647, %v2698_v17 }
 0x1bd   :  { %v1297_v43 = vpop.f32.mrf.mxu0  ;;  %v604_v33 = vsub.f32 1.0, %v603_v51  ;;  %v613_v21 = vand.u32 2147483648, %v2698_v17  ;;  %vm607_vm14 = vweird.f32 %v2698_v17  ;;  %v635_v3 = vadd.f32 0.014752088, %v634_v20 }
 0x1be   :  { %v2731_v7 = vadd.f32 %v2526_v38, %v1297_v43  ;;  %v1379_v13 = vsel %vm1378_vm10, %v1824_v26, %v1375_v23  ;;  %v1301_v38 = vmul.f32 0.5, %v2555_v25  ;;  %v551_v26 = vmul.f32 %v2667_v46, %v2538_v19 }
 0x1bf   :  { %v1384_v10 = vsel %vm1381_vm12, %v1383_v36, %v1379_v13  ;;  %v1390_v1 = vmul.f32 2.1237322e-06, %v2728_v30  ;;  %v1472_v18 = vmul.f32 %v1468_v47, %v2654_v49  ;;  %v625_v19 = vmul.f32 %v624_v0, %v2645_v58  ;;  %1553 = vmatpush.bf16.msrb.mxu3 %v1773_v60 }
 0x1c0   :  { %v1385_v59 = vmul.f32 %v1384_v10, %v1360_v54  ;;  %v2742_v28 = vmul.f32 0.70710677, %v2731_v7  ;;  %v576_v46 = vmul.f32 %v575_v27, %v551_v26  ;;  %v672_v14 = vmul.f32 3.8918573e-05, %v2691_v31 }
 0x1c1   :  { %v1391_v11 = vadd.f32 0.00028619796, %v1390_v1  ;;  %v605_v9 = vmul.f32 %v1826_v56, %v604_v33  ;;  %vm608_vm15 = vweird.f32 %v1826_v56  ;;  %v664_v22 = vadd.f32 0.0036580483, %v663_v55 }
 0x1c2   :  { %v1710_v63 = vclamps-f32 %v1385_v59, 1.0  ;;  %v1428_v25 = vmul.f32 %v2742_v28, %v2742_v28  ;;  %v1623_v40 = vclamps-f32 %v576_v46, 1.0  ;;  %v636_v4 = vmul.f32 %v635_v3, %v2645_v58  ;;  %vm609_vm0 = vmor %vm607_vm14, %vm608_vm15 }
 0x1c3   :  { %v673_v29 = vadd.f32 0.001143296, %v672_v14  ;;  %v606_v32 = vadd.f32 %v1826_v56, %v605_v9  ;;  %v614_v44 = vor.u32 1.1754944e-38, %v613_v21  ;;  %v1401_v35 = vmul.f32 3.8918573e-05, %v2728_v30 }
 0x1c4   :  { %v1469_v5 = vadd.f32 1.0, %v1710_v63  ;;  %v2759_v49 = vmin.f32 %v1428_v25, 16.0  ;;  %v1392_v23 = vmul.f32 %v1391_v11, %v2728_v30  ;;  %v637_v43 = vadd.f32 0.112945676, %v636_v4 }
 0x1c5   :  { %v674_v41 = vmul.f32 %v673_v29, %v2691_v31  ;;  %v610_v37 = vsel %vm609_vm0, %v1826_v56, %v606_v32  ;;  %vm612_vm1 = vcmp.eq.f32.partialorder %v611_v48, 8.507059e+37  ;;  %v1402_v16 = vadd.f32 0.001143296, %v1401_v35 }
 0x1c6   :  { %v1473_v53 = vmul.f32 %v1469_v5, %v1301_v38  ;;  %v1430_v2 = vmul.f32 2.1237322e-06, %v2759_v49  ;;  %v1441_v15 = vmul.f32 3.8918573e-05, %v2759_v49  ;;  %v531_v24 = vmul.f32 0.5, %v2532_v39 }
 0x1c7   :  { %v626_v47 = vadd.f32 0.05243302, %v625_v19  ;;  %v615_v54 = vsel %vm612_vm1, %v614_v44, %v610_v37  ;;  %v638_v13 = vmul.f32 %v637_v43, %v2645_v58  ;;  %v665_v45 = vmul.f32 %v664_v22, %v2691_v31 }
 0x1c8   :  { %v1476_v34 = vpack.c.bf16 %v1473_v53, %v1472_v18  ;;  %v1431_v36 = vadd.f32 0.00028619796, %v1430_v2  ;;  %v616_v10 = vmul.f32 %v615_v54, %v591_v12  ;;  %v675_v17 = vadd.f32 0.014752088, %v674_v41 }
 0x1c9   :  { %v1403_v0 = vmul.f32 %v1402_v16, %v2728_v30  ;;  %v1393_v50 = vadd.f32 0.0036580483, %v1392_v23  ;;  %v639_v59 = vadd.f32 0.4994258, %v638_v13  ;;  %v1442_v27 = vadd.f32 0.001143296, %v1441_v15 }
 0x1ca   :  { %1554 = vmatmul.bf16.vlgmr.msrb.gmra.mxu3 %v1476_v34  ;;  %v1432_v38 = vmul.f32 %v1431_v36, %v2759_v49  ;;  %v1624_v56 = vclamps-f32 %v616_v10, 1.0  ;;  %v699_v26 = vadd.f32 1.0, %v1623_v40  ;;  %v676_v1 = vmul.f32 %v675_v17, %v2691_v31 }
 0x1cb   :  { %v1404_v39 = vadd.f32 0.014752088, %v1403_v0  ;;  %v532_v20 = vmul.f32 0.5, %v2552_v8  ;;  %v627_v18 = vmul.f32 %v626_v47, %v2645_v58  ;;  %v640_v63 = vmul.f32 %v639_v59, %v2645_v58 }
 0x1cc   :  { %v1443_v12 = vmul.f32 %v1442_v27, %v2759_v49  ;;  %v666_v25 = vadd.f32 0.05243302, %v665_v45  ;;  %v700_v51 = vadd.f32 1.0, %v1624_v56  ;;  %v677_v60 = vadd.f32 0.112945676, %v676_v1 }
 0x1cd   :  { %v1405_v19 = vmul.f32 %v1404_v39, %v2728_v30  ;;  %v1394_v55 = vmul.f32 %v1393_v50, %v2728_v30  ;;  %v1433_v46 = vadd.f32 0.0036580483, %v1432_v38  ;;  %v641_v48 = vadd.f32 1.0, %v640_v63 }
 0x1ce   :  { %v1444_v5 = vadd.f32 0.014752088, %v1443_v12  ;;  %v703_v33 = vmul.f32 %v699_v26, %v531_v24  ;;  %v704_v21 = vmul.f32 %v700_v51, %v532_v20  ;;  %v678_v8 = vmul.f32 %v677_v60, %v2691_v31 }
 0x1cf   :  { %v1406_v11 = vadd.f32 0.112945676, %v1405_v19  ;;  %v628_v3 = vadd.f32 0.18741608, %v627_v18  ;;  %1827 = vrcp.f32 %v641_v48  ;;  %v667_v14 = vmul.f32 %v666_v25, %v2691_v31 }
 0x1d0   :  { %v707_v53 = vpack.c.bf16 %v704_v21, %v703_v33  ;;  %v679_v2 = vadd.f32 0.4994258, %v678_v8  ;;  %v1395_v22 = vadd.f32 0.05243302, %v1394_v55  ;;  %v1434_v40 = vmul.f32 %v1433_v46, %v2759_v49 }
 0x1d1   :  { %v1407_v9 = vmul.f32 %v1406_v11, %v2728_v30  ;;  %v1445_v4 = vmul.f32 %v1444_v5, %v2759_v49  ;;  %v629_v34 = vmul.f32 %v628_v3, %v2645_v58  ;;  %v668_v35 = vadd.f32 0.18741608, %v667_v14 }
 0x1d2   :  { %785 = vmatmul.bf16.vlgmr.msra.gmra.mxu2 %v707_v53  ;;  %v680_v29 = vmul.f32 %v679_v2, %v2691_v31  ;;  %v1396_v41 = vmul.f32 %v1395_v22, %v2728_v30  ;;  %v1435_v37 = vadd.f32 0.05243302, %v1434_v40  ;;  %v653_v17 = vand.u32 2147483648, %v641_v48 }
 0x1d3   :  { %v1408_v32 = vadd.f32 0.4994258, %v1407_v9  ;;  %v1446_v44 = vadd.f32 0.112945676, %v1445_v4  ;;  %v630_v47 = vadd.f32 1.1283791, %v629_v34  ;;  %v669_v54 = vmul.f32 %v668_v35, %v2691_v31 }
 0x1d4   :  { %v681_v23 = vadd.f32 1.0, %v680_v29  ;;  %v1397_v10 = vadd.f32 0.18741608, %v1396_v41  ;;  %v1436_v58 = vmul.f32 %v1435_v37, %v2759_v49  ;;  %v651_v50 = vand.u32 2147483647, %v641_v48 }
 0x1d5   :  { %v1409_v36 = vmul.f32 %v1408_v32, %v2728_v30  ;;  %v1828_v43 = vpop.eup %1827  ;;  %v1447_v16 = vmul.f32 %v1446_v44, %v2759_v49  ;;  %v631_v27 = vmul.f32 %v630_v47, %v2624_v6  ;;  %vm647_vm2 = vweird.f32 %v641_v48 }
 0x1d6   :  { %v643_v15 = vmul.f32 %v1828_v43, %v641_v48  ;;  %1829 = vrcp.f32 %v681_v23  ;;  %vm648_vm11 = vweird.f32 %v1828_v43  ;;  %v1398_v31 = vmul.f32 %v1397_v10, %v2728_v30 }
 0x1d7   :  { %v1410_v24 = vadd.f32 1.0, %v1409_v36  ;;  %v1448_v45 = vadd.f32 0.4994258, %v1447_v16  ;;  %v670_v1 = vadd.f32 1.1283791, %v669_v54  ;;  %vm649_vm3 = vmor %vm647_vm2, %vm648_vm11  ;;  %v654_v39 = vor.u32 1.1754944e-38, %v653_v17 }
 0x1d8   :  { %v644_v13 = vsub.f32 1.0, %v643_v15  ;;  %v1437_v18 = vadd.f32 0.18741608, %v1436_v58  ;;  %vm652_vm4 = vcmp.eq.f32.partialorder %v651_v50, 8.507059e+37  ;;  %v693_v6 = vand.u32 2147483648, %v681_v23 }
 0x1d9   :  { %1831 = vrcp.f32 %v1410_v24  ;;  %v1449_v38 = vmul.f32 %v1448_v45, %v2759_v49  ;;  %v1399_v55 = vadd.f32 1.1283791, %v1398_v31  ;;  %v691_v48 = vand.u32 2147483647, %v681_v23 }
 0x1da   :  { %v645_v0 = vmul.f32 %v1828_v43, %v644_v13  ;;  %v671_v30 = vmul.f32 %v670_v1, %v2665_v52  ;;  %v1438_v5 = vmul.f32 %v1437_v18, %v2759_v49  ;;  %vm687_vm6 = vweird.f32 %v681_v23  ;;  %v1786_v1 = vld [vmem:[%s2850_s7] ss:$0 sm:$0xff] }
 0x1db   :  { %v2798_v26 = vadd.f32 1.0, %v1449_v38  ;;  %v1420_v8 = vand.u32 2147483647, %v1410_v24  ;;  %v1422_v11 = vand.u32 2147483648, %v1410_v24  ;;  %v694_v53 = vor.u32 1.1754944e-38, %v693_v6 }
 0x1dc   :  { %v1830_v59 = vpop.eup %1829  ;;  %v646_v56 = vadd.f32 %v1828_v43, %v645_v0  ;;  %v1400_v9 = vmul.f32 %v1399_v55, %v2689_v61  ;;  %vm692_vm9 = vcmp.eq.f32.partialorder %v691_v48, 8.507059e+37  ;;  %v1439_v52 = vadd.f32 1.1283791, %v1438_v5 }
 0x1dd   :  { %v683_v20 = vmul.f32 %v1830_v59, %v681_v23  ;;  %1833 = vrcp.f32 %v2798_v26  ;;  %vm688_vm5 = vweird.f32 %v1830_v59  ;;  %vm1416_vm10 = vweird.f32 %v1410_v24 }
 0x1de   :  { %v650_v63 = vsel %vm649_vm3, %v1828_v43, %v646_v56  ;;  %vm689_vm7 = vmor %vm687_vm6, %vm688_vm5  ;;  %vm1421_vm13 = vcmp.eq.f32.partialorder %v1420_v8, 8.507059e+37  ;;  %v1423_v32 = vor.u32 1.1754944e-38, %v1422_v11  ;;  %v1460_v23 = vand.u32 2147483647, %v2798_v26 }
 0x1df   :  { %v1832_v12 = vpop.eup %1831  ;;  %v655_v25 = vsel %vm652_vm4, %v654_v39, %v650_v63  ;;  %v684_v51 = vsub.f32 1.0, %v683_v20  ;;  %v1462_v36 = vand.u32 2147483648, %v2798_v26  ;;  %v533_v37 = vmul.f32 0.5, %v2610_v62 }
 0x1e0   :  { %v656_v60 = vmul.f32 %v655_v25, %v631_v27  ;;  %v1412_v19 = vmul.f32 %v1832_v12, %v1410_v24  ;;  %vm1417_vm8 = vweird.f32 %v1832_v12  ;;  %v534_v15 = vmul.f32 0.5, %v2648_v42 }
 0x1e1   :  { %v685_v46 = vmul.f32 %v1830_v59, %v684_v51  ;;  %vm1418_vm12 = vmor %vm1416_vm10, %vm1417_vm8  ;;  %vm1456_vm15 = vweird.f32 %v2798_v26  ;;  %v1440_v54 = vmul.f32 %v1439_v52, %v2742_v28  ;;  %vm1461_vm1 = vcmp.eq.f32.partialorder %v1460_v23, 8.507059e+37 }
 0x1e2   :  { %v1413_v33 = vsub.f32 1.0, %v1412_v19  ;;  %v1625_v14 = vclamps-f32 %v656_v60, 1.0  ;;  %v1463_v13 = vor.u32 1.1754944e-38, %v1462_v36  ;;  %v1302_v42 = vmul.f32 0.5, %v2676_v57  ;;  %v1785_v57 = vld [vmem:[%s2850_s7] ss:$0 sm:$0xff] }
 0x1e3   :  { %v686_v21 = vadd.f32 %v1830_v59, %v685_v46  ;;  %v1834_v3 = vpop.eup %1833  ;;  %v1303_v27 = vmul.f32 0.5, %v2731_v7 }
 0x1e4   :  { %v1414_v2 = vmul.f32 %v1832_v12, %v1413_v33  ;;  %v1452_v40 = vmul.f32 %v1834_v3, %v2798_v26  ;;  %v701_v34 = vadd.f32 1.0, %v1625_v14  ;;  %vm1457_vm14 = vweird.f32 %v1834_v3 }
 0x1e5   :  { %v690_v22 = vsel %vm689_vm7, %v1830_v59, %v686_v21  ;;  %vm1458_vm0 = vmor %vm1456_vm15, %vm1457_vm14 }
 0x1e6   :  { %v695_v4 = vsel %vm692_vm9, %v694_v53, %v690_v22  ;;  %v1415_v49 = vadd.f32 %v1832_v12, %v1414_v2  ;;  %v1453_v44 = vsub.f32 1.0, %v1452_v40  ;;  %v705_v45 = vmul.f32 %v701_v34, %v533_v37 }
 0x1e7   :  { %v696_v29 = vmul.f32 %v695_v4, %v671_v30 }
 0x1e8   :  { %v1419_v35 = vsel %vm1418_vm12, %v1832_v12, %v1415_v49  ;;  %v1454_v41 = vmul.f32 %v1834_v3, %v1453_v44 }
 0x1e9   :  { %v1626_v61 = vclamps-f32 %v696_v29, 1.0  ;;  %v1424_v43 = vsel %vm1421_vm13, %v1423_v32, %v1419_v35 }
 0x1ea   :  { %v1425_v16 = vmul.f32 %v1424_v43, %v1400_v9  ;;  %v1455_v47 = vadd.f32 %v1834_v3, %v1454_v41 }
 0x1eb   :  { %v702_v24 = vadd.f32 1.0, %v1626_v61 }
 0x1ec   :  { %v1711_v58 = vclamps-f32 %v1425_v16, 1.0  ;;  %v1459_v17 = vsel %vm1458_vm0, %v1834_v3, %v1455_v47 }
 0x1ed   :  { %v706_v10 = vmul.f32 %v702_v24, %v534_v15  ;;  %v1464_v0 = vsel %vm1461_vm1, %v1463_v13, %v1459_v17 }
 0x1ee   :  { %v1465_v38 = vmul.f32 %v1464_v0, %v1440_v54  ;;  %v1470_v59 = vadd.f32 1.0, %v1711_v58 }
 0x1ef   :  { %v708_v50 = vpack.c.bf16 %v706_v10, %v705_v45 }
 0x1f0   :  { %v1712_v62 = vclamps-f32 %v1465_v38, 1.0  ;;  %v1474_v26 = vmul.f32 %v1470_v59, %v1302_v42 }
 0x1f1   :  { %790 = vmatmul.bf16.gmra.mxu2 %v708_v50 }
 0x1f2   :  { %v1471_v56 = vadd.f32 1.0, %v1712_v62 }
 0x1f4   :  { %v1475_v28 = vmul.f32 %v1471_v56, %v1303_v27 }
 0x1f6   :  { %v1477_v31 = vpack.c.bf16 %v1475_v28, %v1474_v26 }
 0x1f8   :  { %1559 = vmatmul.bf16.gmra.mxu3 %v1477_v31 }
 0x24d   :  { %v1555_v39 = vpop.f32.mrf.mxu3 }
 0x24e   :  { %v1556_v20 = vadd.f32 %v1786_v1, %v1555_v39 }
 0x250   :  { %1565 = vst [vmem:[%s2852_s8 + $0x20] sm:$0xff] %v1556_v20 }
 0x255   :  { %v1557_v18 = vpop.f32.mrf.mxu3  ;;  %v786_v63 = vpop.f32.mrf.mxu2 }
 0x256   :  { %v1558_v7 = vadd.f32 %v1786_v1, %v1557_v18  ;;  %v787_v12 = vadd.f32 %v1785_v57, %v786_v63 }
 0x258   :  { %1566 = vst [vmem:[%s2852_s8 + $0x28] sm:$0xff] %v1558_v7 }
 0x259   :  { %796 = vst [vmem:[%s2852_s8] sm:$0xff] %v787_v12 }
 0x25d   :  { %v788_v25 = vpop.f32.mrf.mxu2 }
 0x25e   :  { %v789_v51 = vadd.f32 %v1785_v57, %v788_v25 }
 0x260   :  { %797 = vst [vmem:[%s2852_s8 + $0x8] sm:$0xff] %v789_v51 }
 0x274   :  { %v791_v60 = vpop.f32.mrf.mxu2 }
 0x275   :  { %v792_v6 = vadd.f32 %v1785_v57, %v791_v60 }
 0x277   :  { %798 = vst [vmem:[%s2852_s8 + $0x10] sm:$0xff] %v792_v6 }
 0x27b   :  { %v1560_v19 = vpop.f32.mrf.mxu3 }
 0x27c   :  { %v793_v55 = vpop.f32.mrf.mxu2  ;;  %v1561_v46 = vadd.f32 %v1786_v1, %v1560_v19 }
 0x27d   :  { %v794_v48 = vadd.f32 %v1785_v57, %v793_v55 }
 0x27e   :  { %1567 = vst [vmem:[%s2852_s8 + $0x30] sm:$0xff] %v1561_v46 }
 0x27f   :  { %799 = vst [vmem:[%s2852_s8 + $0x18] sm:$0xff] %v794_v48 }
 0x283   :  { %v1562_v30 = vpop.f32.mrf.mxu3 }
 0x284   :  { %v1563_v5 = vadd.f32 %v1786_v1, %v1562_v30 }
 0x286   :  { %1568 = vst [vmem:[%s2852_s8 + $0x38] sm:$0xff] %v1563_v5 }

</bundles_post_ra>
